<compile_context>
chip_gen: v7x
topology: tpu7x:2x2x1
jax: 0.10.0
libtpu: 0.0.40
codegen_flags: <defaults>
</compile_context>

<pallas_src>
from collections import OrderedDict

import numpy as np
import jax
import jax.numpy as jnp
from jax import lax
from jax.experimental import pallas as pl
from jax.experimental.pallas import tpu as pltpu


# ----------------------------------------------------------------------------
# helpers
# ----------------------------------------------------------------------------
def _lane_pack(x):
    """Flatten per-sample and present a lane-dense (B, R, 128) view if possible."""
    B = x.shape[0]
    n = int(np.prod(x.shape[1:]))
    if n % 128 == 0:
        return x.reshape(B, n // 128, 128), n
    return x.reshape(B, 1, n), n


# ----------------------------------------------------------------------------
# fused Pallas kernel (one grid step == one batch sample)
# ----------------------------------------------------------------------------
def _make_loss_g_kernel(C, H, W, n_img, n_c, n_u, lam_disc, lam_x, lam_z):
    K9 = C * 9
    inv_hw = 1.0 / float(H * W)
    inv_img = 1.0 / float(n_img)
    inv_c = 1.0 / float(n_c)
    inv_cu = 1.0 / float(n_c + n_u)

    def sum_abs_diff(a_ref, b_ref):
        # (1, R, L) lane-dense tiles -> (1, 1, 1) per-sample sum |a - b|
        d = jnp.abs(a_ref[...].astype(jnp.float32) - b_ref[...].astype(jnp.float32))
        s = jnp.sum(d, axis=2, keepdims=True)      # lane reduce (XLU)
        return jnp.sum(s, axis=1, keepdims=True)   # sublane reduce

    def kernel(scal_ref,
               g_ta_ref, g_tb_ref,
               x_ta_ref, x_tata_ref, x_tb_ref, x_tbtb_ref,
               c_ta_ref, c_tatb_ref, c_tata_ref,
               c_tb_ref, c_tbtb_ref, c_tbta_ref,
               u_ta_ref, u_tata_ref, u_tbs_ref, u_tbta_ref,
               o_ref):

        def gan_g(xg_ref, w_base, b_idx):
            # Single-output-channel 3x3 PatchGAN conv (stride 1, pad 1) as C*9
            # shifted windows of the padded (C, H+2, W+2) tile — no im2col.
            acc = jnp.zeros((H, W), jnp.float32)
            for c in range(C):
                for di in range(3):
                    for dj in range(3):
                        wv = scal_ref[w_base + c * 9 + di * 3 + dj]     # SMEM scalar
                        win = xg_ref[0, c, pl.ds(di, H), pl.ds(dj, W)]  # (H, W)
                        acc = acc + wv * win.astype(jnp.float32)
            d = acc + scal_ref[b_idx]            # bias with LSGAN "-1" pre-folded
            s = jnp.sum(d * d, axis=1, keepdims=True)
            s = jnp.sum(s, axis=0, keepdims=True)
            return s.reshape(1, 1, 1)

        # --- GAN generator losses (LSGAN (D(fake)-1)^2, per-sample mean) -----
        l_gen_ta = (lam_disc * inv_hw) * gan_g(g_ta_ref, 0, 2 * K9)
        l_gen_tb = (lam_disc * inv_hw) * gan_g(g_tb_ref, K9, 2 * K9 + 1)

        # --- image reconstruction (per-sample MAE) ----------------------------
        l_x_tata = (lam_x * inv_img) * sum_abs_diff(x_ta_ref, x_tata_ref)
        l_x_tbtb = (lam_x * inv_img) * sum_abs_diff(x_tb_ref, x_tbtb_ref)

        # --- latent reconstruction (concat handled as weighted in-kernel sum) -
        l_tatb = (lam_z * inv_c) * sum_abs_diff(c_ta_ref, c_tatb_ref)
        l_tata = (lam_z * inv_cu) * (sum_abs_diff(c_ta_ref, c_tata_ref)
                                     + sum_abs_diff(u_ta_ref, u_tata_ref))
        l_tbtb = (lam_z * inv_c) * sum_abs_diff(c_tb_ref, c_tbtb_ref)
        l_tbta = (lam_z * inv_cu) * (sum_abs_diff(c_tb_ref, c_tbta_ref)
                                     + sum_abs_diff(u_tbs_ref, u_tbta_ref))

        # --- pack the 8 per-sample losses into one (1, 1, 8) slab -------------
        vals = (l_gen_ta, l_gen_tb, l_x_tata, l_x_tbtb,
                l_tatb, l_tata, l_tbtb, l_tbta)
        idx = lax.broadcasted_iota(jnp.int32, (1, 1, 8), 2)
        out = jnp.zeros((1, 1, 8), jnp.float32)
        for k, v in enumerate(vals):
            out = out + jnp.where(idx == k, v, 0.0)
        o_ref[...] = out

    return kernel


# ----------------------------------------------------------------------------
# wrapper (glue in plain JAX) — single pallas_call for the whole forward
# ----------------------------------------------------------------------------
def loss_G_forward(params,
                   x_TA, x_TB, x_TATB, x_TATA, x_TBTB, x_TBTA,
                   c_TA, u_TA, c_TATB, c_TATA, u_TATA,
                   c_TB, u_TB, u_TB_sampled, c_TBTB, c_TBTA, u_TBTA,
                   lambda_disc=1.0, lambda_x_id=1.0, lambda_z_id=1.0):
    """JAX/Pallas equivalent of _loss_G.forward; returns per-sample losses (B,)."""
    del u_TB  # unused in the original forward (kept for signature fidelity)
    B, C, H, W = x_TA.shape
    K9 = C * 9

    # Discriminator inputs: padded once so the 3x3 conv halo is available.
    pad = lambda t: jnp.pad(t, ((0, 0), (0, 0), (1, 1), (1, 1)))
    g_TA = pad(x_TBTA)      # disc_TA judges fake x_TBTA
    g_TB = pad(x_TATB)      # disc_TB judges fake x_TATB

    # Lane-dense flattened views for the MAE reductions (contiguous reshapes).
    x_ta_r, n_img = _lane_pack(x_TA)
    x_tata_r, _ = _lane_pack(x_TATA)
    x_tb_r, _ = _lane_pack(x_TB)
    x_tbtb_r, _ = _lane_pack(x_TBTB)
    c_ta_r, n_c = _lane_pack(c_TA)
    c_tatb_r, _ = _lane_pack(c_TATB)
    c_tata_r, _ = _lane_pack(c_TATA)
    c_tb_r, _ = _lane_pack(c_TB)
    c_tbtb_r, _ = _lane_pack(c_TBTB)
    c_tbta_r, _ = _lane_pack(c_TBTA)
    u_ta_r, n_u = _lane_pack(u_TA)
    u_tata_r, _ = _lane_pack(u_TATA)
    u_tbs_r, _ = _lane_pack(u_TB_sampled)
    u_tbta_r, _ = _lane_pack(u_TBTA)

    # Conv weights + (bias - 1) -> one small SMEM scalar table.
    scal = jnp.concatenate([
        params['w_TA'].reshape(-1).astype(jnp.float32),
        params['w_TB'].reshape(-1).astype(jnp.float32),
        params['b_TA'].reshape(-1).astype(jnp.float32) - 1.0,
        params['b_TB'].reshape(-1).astype(jnp.float32) - 1.0,
    ])
    assert scal.shape == (2 * K9 + 2,)

    kernel = _make_loss_g_kernel(C, H, W, n_img, n_c, n_u,
                                 float(lambda_disc), float(lambda_x_id),
                                 float(lambda_z_id))

    def batch_spec(arr):
        nd = arr.ndim
        return pl.BlockSpec((1,) + tuple(arr.shape[1:]),
                            lambda i, _nd=nd: (i,) + (0,) * (_nd - 1))

    smem_spec = pl.BlockSpec(memory_space=pltpu.MemorySpace.SMEM)

    tensor_args = (g_TA, g_TB,
                   x_ta_r, x_tata_r, x_tb_r, x_tbtb_r,
                   c_ta_r, c_tatb_r, c_tata_r,
                   c_tb_r, c_tbtb_r, c_tbta_r,
                   u_ta_r, u_tata_r, u_tbs_r, u_tbta_r)

    out = pl.pallas_call(
        kernel,
        out_shape=jax.ShapeDtypeStruct((B, 1, 8), jnp.float32),
        grid_spec=pltpu.PrefetchScalarGridSpec(
            num_scalar_prefetch=0,
            grid=(B,),
            in_specs=[smem_spec] + [batch_spec(a) for a in tensor_args],
            out_specs=pl.BlockSpec((1, 1, 8), lambda i: (i, 0, 0)),
        ),
        compiler_params=pltpu.CompilerParams(
            dimension_semantics=("parallel",)),
    )(scal, *tensor_args)

    losses = out[:, 0, :]                                   # (B, 8)
    l_gen_TA, l_gen_TB = losses[:, 0], losses[:, 1]
    l_rec_img = losses[:, 2] + losses[:, 3]
    l_rec_feat = losses[:, 4] + losses[:, 5] + losses[:, 6] + losses[:, 7]
    loss_G = l_gen_TA + l_gen_TB + l_rec_img + l_rec_feat

    return OrderedDict([
        ('l_G', loss_G),
        ('l_gen_TA', l_gen_TA),
        ('l_gen_TB', l_gen_TB),
        ('l_rec_img', l_rec_img),
        ('l_rec_features', l_rec_feat),
    ])


# ----------------------------------------------------------------------------
# pure-JAX reference (mirrors the PyTorch module semantics) for self-checking
# ----------------------------------------------------------------------------
def _reference_losses(params,
                      x_TA, x_TB, x_TATB, x_TATA, x_TBTB, x_TBTA,
                      c_TA, u_TA, c_TATB, c_TATA, u_TATA,
                      c_TB, u_TB, u_TB_sampled, c_TBTB, c_TBTA, u_TBTA,
                      lambda_disc=1.0, lambda_x_id=1.0, lambda_z_id=1.0):
    del u_TB

    def per_sample_mean(t):
        return jnp.mean(t.reshape(t.shape[0], -1), axis=1)

    def mae_ps(a, b):
        return per_sample_mean(jnp.abs(a - b))

    def gan_g_ps(x_fake, w, b):
        d = lax.conv_general_dilated(
            x_fake.astype(jnp.float32), w.astype(jnp.float32),
            window_strides=(1, 1), padding="SAME",
            dimension_numbers=("NCHW", "OIHW", "NCHW"),
            precision=lax.Precision.HIGHEST)
        d = d + b.reshape(1, -1, 1, 1)
        return per_sample_mean((d - 1.0) ** 2)

    l_gen_TA = lambda_disc * gan_g_ps(x_TBTA, params['w_TA'], params['b_TA'])
    l_gen_TB = lambda_disc * gan_g_ps(x_TATB, params['w_TB'], params['b_TB'])
    l_rec_img = lambda_x_id * (mae_ps(x_TA, x_TATA) + mae_ps(x_TB, x_TBTB))
    l_rec_feat = lambda_z_id * (
        mae_ps(c_TA, c_TATB)
        + mae_ps(jnp.concatenate([c_TA, u_TA], axis=1),
                 jnp.concatenate([c_TATA, u_TATA], axis=1))
        + mae_ps(c_TB, c_TBTB)
        + mae_ps(jnp.concatenate([c_TB, u_TB_sampled], axis=1),
                 jnp.concatenate([c_TBTA, u_TBTA], axis=1)))
    return OrderedDict([
        ('l_G', l_gen_TA + l_gen_TB + l_rec_img + l_rec_feat),
        ('l_gen_TA', l_gen_TA),
        ('l_gen_TB', l_gen_TB),
        ('l_rec_img', l_rec_img),
        ('l_rec_features', l_rec_feat),
    ])


# ----------------------------------------------------------------------------
# Demo
# ----------------------------------------------------------------------------
if __name__ == "__main__":
    key = jax.random.PRNGKey(0)
    ks = jax.random.split(key, 32)

    B, C, H, W = 2, 4, 16, 16          # images (MRI modalities as channels)
    Cc, Cu, h, w = 8, 4, 4, 4          # latent "common" / "unique" codes

    def rnd(k, shape):
        return jax.random.normal(k, shape, dtype=jnp.float32)

    # images
    x_TA   = rnd(ks[0], (B, C, H, W))
    x_TB   = rnd(ks[1], (B, C, H, W))
    x_TATB = rnd(ks[2], (B, C, H, W))
    x_TATA = rnd(ks[3], (B, C, H, W))
    x_TBTB = rnd(ks[4], (B, C, H, W))
    x_TBTA = rnd(ks[5], (B, C, H, W))
    # latent codes
    c_TA         = rnd(ks[6],  (B, Cc, h, w))
    u_TA         = rnd(ks[7],  (B, Cu, h, w))
    c_TATB       = rnd(ks[8],  (B, Cc, h, w))
    c_TATA       = rnd(ks[9],  (B, Cc, h, w))
    u_TATA       = rnd(ks[10], (B, Cu, h, w))
    c_TB         = rnd(ks[11], (B, Cc, h, w))
    u_TB         = rnd(ks[12], (B, Cu, h, w))   # unused in forward (kept for fidelity)
    u_TB_sampled = rnd(ks[13], (B, Cu, h, w))
    c_TBTB       = rnd(ks[14], (B, Cc, h, w))
    c_TBTA       = rnd(ks[15], (B, Cc, h, w))
    u_TBTA       = rnd(ks[16], (B, Cu, h, w))

    # deterministic discriminator parameters (Conv2d(C, 1, 3, padding=1) each)
    params = {
        'w_TA': 0.1 * rnd(ks[20], (1, C, 3, 3)),
        'b_TA': jnp.zeros((1,), jnp.float32),
        'w_TB': 0.1 * rnd(ks[21], (1, C, 3, 3)),
        'b_TB': jnp.zeros((1,), jnp.float32),
    }

    args = (x_TA, x_TB, x_TATB, x_TATA, x_TBTB, x_TBTA,
            c_TA, u_TA, c_TATB, c_TATA, u_TATA,
            c_TB, u_TB, u_TB_sampled, c_TBTB, c_TBTA, u_TBTA)

    losses = loss_G_forward(params, *args)
    for v in losses.values():
        jax.block_until_ready(v)

    ref = _reference_losses(params, *args)
    for name in losses:
        got = np.asarray(losses[name])
        exp = np.asarray(ref[name])
        assert np.allclose(got, exp, rtol=1e-3, atol=1e-3), \
            f"mismatch in {name}: {got} vs {exp}"

    print("KERNEL_OK")
</pallas_src>

<mosaic_0001>
module attributes {stable_mosaic.version = 11 : i64} {
  func.func @kernel(%arg0: i32, %arg1: memref<74xf32, #tpu.memory_space<smem>>, %arg2: memref<1x4x18x18xf32, #tpu.memory_space<vmem>>, %arg3: memref<1x4x18x18xf32, #tpu.memory_space<vmem>>, %arg4: memref<1x8x128xf32, #tpu.memory_space<vmem>>, %arg5: memref<1x8x128xf32, #tpu.memory_space<vmem>>, %arg6: memref<1x8x128xf32, #tpu.memory_space<vmem>>, %arg7: memref<1x8x128xf32, #tpu.memory_space<vmem>>, %arg8: memref<1x1x128xf32, #tpu.memory_space<vmem>>, %arg9: memref<1x1x128xf32, #tpu.memory_space<vmem>>, %arg10: memref<1x1x128xf32, #tpu.memory_space<vmem>>, %arg11: memref<1x1x128xf32, #tpu.memory_space<vmem>>, %arg12: memref<1x1x128xf32, #tpu.memory_space<vmem>>, %arg13: memref<1x1x128xf32, #tpu.memory_space<vmem>>, %arg14: memref<1x1x64xf32, #tpu.memory_space<vmem>>, %arg15: memref<1x1x64xf32, #tpu.memory_space<vmem>>, %arg16: memref<1x1x64xf32, #tpu.memory_space<vmem>>, %arg17: memref<1x1x64xf32, #tpu.memory_space<vmem>>, %arg18: memref<1x1x8xf32, #tpu.memory_space<vmem>>) attributes {dimension_semantics = [#tpu.dimension_semantics<parallel>], iteration_bounds = array<i64: 2>, scalar_prefetch = 0 : i64, scratch_operands = 0 : i64, tpu.core_type = #tpu.core_type<tc>, window_params = [{transform_indices = @transform_0, window_bounds = array<i64: 74>}, {transform_indices = @transform_1, window_bounds = array<i64: 1, 4, 18, 18>}, {transform_indices = @transform_2, window_bounds = array<i64: 1, 4, 18, 18>}, {transform_indices = @transform_3, window_bounds = array<i64: 1, 8, 128>}, {transform_indices = @transform_4, window_bounds = array<i64: 1, 8, 128>}, {transform_indices = @transform_5, window_bounds = array<i64: 1, 8, 128>}, {transform_indices = @transform_6, window_bounds = array<i64: 1, 8, 128>}, {transform_indices = @transform_7, window_bounds = array<i64: 1, 1, 128>}, {transform_indices = @transform_8, window_bounds = array<i64: 1, 1, 128>}, {transform_indices = @transform_9, window_bounds = array<i64: 1, 1, 128>}, {transform_indices = @transform_10, window_bounds = array<i64: 1, 1, 128>}, {transform_indices = @transform_11, window_bounds = array<i64: 1, 1, 128>}, {transform_indices = @transform_12, window_bounds = array<i64: 1, 1, 128>}, {transform_indices = @transform_13, window_bounds = array<i64: 1, 1, 64>}, {transform_indices = @transform_14, window_bounds = array<i64: 1, 1, 64>}, {transform_indices = @transform_15, window_bounds = array<i64: 1, 1, 64>}, {transform_indices = @transform_16, window_bounds = array<i64: 1, 1, 64>}, {transform_indices = @transform_17, window_bounds = array<i64: 1, 1, 8>}]} {
    %cst = arith.constant 0.000000e+00 : f32
    %0 = vector.broadcast %cst : f32 to vector<16x16xf32>
    %c0 = arith.constant 0 : index
    %1 = memref.load %arg1[%c0] : memref<74xf32, #tpu.memory_space<smem>>
    %c0_0 = arith.constant 0 : index
    %c0_1 = arith.constant 0 : index
    %c0_2 = arith.constant 0 : index
    %c0_3 = arith.constant 0 : index
    %2 = vector.load %arg2[%c0_0, %c0_1, %c0_2, %c0_3] : memref<1x4x18x18xf32, #tpu.memory_space<vmem>>, vector<1x1x16x16xf32>
    %3 = vector.shape_cast %2 : vector<1x1x16x16xf32> to vector<16x16xf32>
    %4 = vector.broadcast %1 : f32 to vector<16x16xf32>
    %5 = arith.mulf %4, %3 : vector<16x16xf32>
    %6 = arith.addf %0, %5 : vector<16x16xf32>
    %c1 = arith.constant 1 : index
    %7 = memref.load %arg1[%c1] : memref<74xf32, #tpu.memory_space<smem>>
    %c0_4 = arith.constant 0 : index
    %c0_5 = arith.constant 0 : index
    %c0_6 = arith.constant 0 : index
    %c1_7 = arith.constant 1 : index
    %8 = vector.load %arg2[%c0_4, %c0_5, %c0_6, %c1_7] : memref<1x4x18x18xf32, #tpu.memory_space<vmem>>, vector<1x1x16x16xf32>
    %9 = vector.shape_cast %8 : vector<1x1x16x16xf32> to vector<16x16xf32>
    %10 = vector.broadcast %7 : f32 to vector<16x16xf32>
    %11 = arith.mulf %10, %9 : vector<16x16xf32>
    %12 = arith.addf %6, %11 : vector<16x16xf32>
    %c2 = arith.constant 2 : index
    %13 = memref.load %arg1[%c2] : memref<74xf32, #tpu.memory_space<smem>>
    %c0_8 = arith.constant 0 : index
    %c0_9 = arith.constant 0 : index
    %c0_10 = arith.constant 0 : index
    %c2_11 = arith.constant 2 : index
    %14 = vector.load %arg2[%c0_8, %c0_9, %c0_10, %c2_11] : memref<1x4x18x18xf32, #tpu.memory_space<vmem>>, vector<1x1x16x16xf32>
    %15 = vector.shape_cast %14 : vector<1x1x16x16xf32> to vector<16x16xf32>
    %16 = vector.broadcast %13 : f32 to vector<16x16xf32>
    %17 = arith.mulf %16, %15 : vector<16x16xf32>
    %18 = arith.addf %12, %17 : vector<16x16xf32>
    %c3 = arith.constant 3 : index
    %19 = memref.load %arg1[%c3] : memref<74xf32, #tpu.memory_space<smem>>
    %c0_12 = arith.constant 0 : index
    %c0_13 = arith.constant 0 : index
    %c1_14 = arith.constant 1 : index
    %c0_15 = arith.constant 0 : index
    %20 = vector.load %arg2[%c0_12, %c0_13, %c1_14, %c0_15] : memref<1x4x18x18xf32, #tpu.memory_space<vmem>>, vector<1x1x16x16xf32>
    %21 = vector.shape_cast %20 : vector<1x1x16x16xf32> to vector<16x16xf32>
    %22 = vector.broadcast %19 : f32 to vector<16x16xf32>
    %23 = arith.mulf %22, %21 : vector<16x16xf32>
    %24 = arith.addf %18, %23 : vector<16x16xf32>
    %c4 = arith.constant 4 : index
    %25 = memref.load %arg1[%c4] : memref<74xf32, #tpu.memory_space<smem>>
    %c0_16 = arith.constant 0 : index
    %c0_17 = arith.constant 0 : index
    %c1_18 = arith.constant 1 : index
    %c1_19 = arith.constant 1 : index
    %26 = vector.load %arg2[%c0_16, %c0_17, %c1_18, %c1_19] : memref<1x4x18x18xf32, #tpu.memory_space<vmem>>, vector<1x1x16x16xf32>
    %27 = vector.shape_cast %26 : vector<1x1x16x16xf32> to vector<16x16xf32>
    %28 = vector.broadcast %25 : f32 to vector<16x16xf32>
    %29 = arith.mulf %28, %27 : vector<16x16xf32>
    %30 = arith.addf %24, %29 : vector<16x16xf32>
    %c5 = arith.constant 5 : index
    %31 = memref.load %arg1[%c5] : memref<74xf32, #tpu.memory_space<smem>>
    %c0_20 = arith.constant 0 : index
    %c0_21 = arith.constant 0 : index
    %c1_22 = arith.constant 1 : index
    %c2_23 = arith.constant 2 : index
    %32 = vector.load %arg2[%c0_20, %c0_21, %c1_22, %c2_23] : memref<1x4x18x18xf32, #tpu.memory_space<vmem>>, vector<1x1x16x16xf32>
    %33 = vector.shape_cast %32 : vector<1x1x16x16xf32> to vector<16x16xf32>
    %34 = vector.broadcast %31 : f32 to vector<16x16xf32>
    %35 = arith.mulf %34, %33 : vector<16x16xf32>
    %36 = arith.addf %30, %35 : vector<16x16xf32>
    %c6 = arith.constant 6 : index
    %37 = memref.load %arg1[%c6] : memref<74xf32, #tpu.memory_space<smem>>
    %c0_24 = arith.constant 0 : index
    %c0_25 = arith.constant 0 : index
    %c2_26 = arith.constant 2 : index
    %c0_27 = arith.constant 0 : index
    %38 = vector.load %arg2[%c0_24, %c0_25, %c2_26, %c0_27] : memref<1x4x18x18xf32, #tpu.memory_space<vmem>>, vector<1x1x16x16xf32>
    %39 = vector.shape_cast %38 : vector<1x1x16x16xf32> to vector<16x16xf32>
    %40 = vector.broadcast %37 : f32 to vector<16x16xf32>
    %41 = arith.mulf %40, %39 : vector<16x16xf32>
    %42 = arith.addf %36, %41 : vector<16x16xf32>
    %c7 = arith.constant 7 : index
    %43 = memref.load %arg1[%c7] : memref<74xf32, #tpu.memory_space<smem>>
    %c0_28 = arith.constant 0 : index
    %c0_29 = arith.constant 0 : index
    %c2_30 = arith.constant 2 : index
    %c1_31 = arith.constant 1 : index
    %44 = vector.load %arg2[%c0_28, %c0_29, %c2_30, %c1_31] : memref<1x4x18x18xf32, #tpu.memory_space<vmem>>, vector<1x1x16x16xf32>
    %45 = vector.shape_cast %44 : vector<1x1x16x16xf32> to vector<16x16xf32>
    %46 = vector.broadcast %43 : f32 to vector<16x16xf32>
    %47 = arith.mulf %46, %45 : vector<16x16xf32>
    %48 = arith.addf %42, %47 : vector<16x16xf32>
    %c8 = arith.constant 8 : index
    %49 = memref.load %arg1[%c8] : memref<74xf32, #tpu.memory_space<smem>>
    %c0_32 = arith.constant 0 : index
    %c0_33 = arith.constant 0 : index
    %c2_34 = arith.constant 2 : index
    %c2_35 = arith.constant 2 : index
    %50 = vector.load %arg2[%c0_32, %c0_33, %c2_34, %c2_35] : memref<1x4x18x18xf32, #tpu.memory_space<vmem>>, vector<1x1x16x16xf32>
    %51 = vector.shape_cast %50 : vector<1x1x16x16xf32> to vector<16x16xf32>
    %52 = vector.broadcast %49 : f32 to vector<16x16xf32>
    %53 = arith.mulf %52, %51 : vector<16x16xf32>
    %54 = arith.addf %48, %53 : vector<16x16xf32>
    %c9 = arith.constant 9 : index
    %55 = memref.load %arg1[%c9] : memref<74xf32, #tpu.memory_space<smem>>
    %c0_36 = arith.constant 0 : index
    %c1_37 = arith.constant 1 : index
    %c0_38 = arith.constant 0 : index
    %c0_39 = arith.constant 0 : index
    %56 = vector.load %arg2[%c0_36, %c1_37, %c0_38, %c0_39] : memref<1x4x18x18xf32, #tpu.memory_space<vmem>>, vector<1x1x16x16xf32>
    %57 = vector.shape_cast %56 : vector<1x1x16x16xf32> to vector<16x16xf32>
    %58 = vector.broadcast %55 : f32 to vector<16x16xf32>
    %59 = arith.mulf %58, %57 : vector<16x16xf32>
    %60 = arith.addf %54, %59 : vector<16x16xf32>
    %c10 = arith.constant 10 : index
    %61 = memref.load %arg1[%c10] : memref<74xf32, #tpu.memory_space<smem>>
    %c0_40 = arith.constant 0 : index
    %c1_41 = arith.constant 1 : index
    %c0_42 = arith.constant 0 : index
    %c1_43 = arith.constant 1 : index
    %62 = vector.load %arg2[%c0_40, %c1_41, %c0_42, %c1_43] : memref<1x4x18x18xf32, #tpu.memory_space<vmem>>, vector<1x1x16x16xf32>
    %63 = vector.shape_cast %62 : vector<1x1x16x16xf32> to vector<16x16xf32>
    %64 = vector.broadcast %61 : f32 to vector<16x16xf32>
    %65 = arith.mulf %64, %63 : vector<16x16xf32>
    %66 = arith.addf %60, %65 : vector<16x16xf32>
    %c11 = arith.constant 11 : index
    %67 = memref.load %arg1[%c11] : memref<74xf32, #tpu.memory_space<smem>>
    %c0_44 = arith.constant 0 : index
    %c1_45 = arith.constant 1 : index
    %c0_46 = arith.constant 0 : index
    %c2_47 = arith.constant 2 : index
    %68 = vector.load %arg2[%c0_44, %c1_45, %c0_46, %c2_47] : memref<1x4x18x18xf32, #tpu.memory_space<vmem>>, vector<1x1x16x16xf32>
    %69 = vector.shape_cast %68 : vector<1x1x16x16xf32> to vector<16x16xf32>
    %70 = vector.broadcast %67 : f32 to vector<16x16xf32>
    %71 = arith.mulf %70, %69 : vector<16x16xf32>
    %72 = arith.addf %66, %71 : vector<16x16xf32>
    %c12 = arith.constant 12 : index
    %73 = memref.load %arg1[%c12] : memref<74xf32, #tpu.memory_space<smem>>
    %c0_48 = arith.constant 0 : index
    %c1_49 = arith.constant 1 : index
    %c1_50 = arith.constant 1 : index
    %c0_51 = arith.constant 0 : index
    %74 = vector.load %arg2[%c0_48, %c1_49, %c1_50, %c0_51] : memref<1x4x18x18xf32, #tpu.memory_space<vmem>>, vector<1x1x16x16xf32>
    %75 = vector.shape_cast %74 : vector<1x1x16x16xf32> to vector<16x16xf32>
    %76 = vector.broadcast %73 : f32 to vector<16x16xf32>
    %77 = arith.mulf %76, %75 : vector<16x16xf32>
    %78 = arith.addf %72, %77 : vector<16x16xf32>
    %c13 = arith.constant 13 : index
    %79 = memref.load %arg1[%c13] : memref<74xf32, #tpu.memory_space<smem>>
    %c0_52 = arith.constant 0 : index
    %c1_53 = arith.constant 1 : index
    %c1_54 = arith.constant 1 : index
    %c1_55 = arith.constant 1 : index
    %80 = vector.load %arg2[%c0_52, %c1_53, %c1_54, %c1_55] : memref<1x4x18x18xf32, #tpu.memory_space<vmem>>, vector<1x1x16x16xf32>
    %81 = vector.shape_cast %80 : vector<1x1x16x16xf32> to vector<16x16xf32>
    %82 = vector.broadcast %79 : f32 to vector<16x16xf32>
    %83 = arith.mulf %82, %81 : vector<16x16xf32>
    %84 = arith.addf %78, %83 : vector<16x16xf32>
    %c14 = arith.constant 14 : index
    %85 = memref.load %arg1[%c14] : memref<74xf32, #tpu.memory_space<smem>>
    %c0_56 = arith.constant 0 : index
    %c1_57 = arith.constant 1 : index
    %c1_58 = arith.constant 1 : index
    %c2_59 = arith.constant 2 : index
    %86 = vector.load %arg2[%c0_56, %c1_57, %c1_58, %c2_59] : memref<1x4x18x18xf32, #tpu.memory_space<vmem>>, vector<1x1x16x16xf32>
    %87 = vector.shape_cast %86 : vector<1x1x16x16xf32> to vector<16x16xf32>
    %88 = vector.broadcast %85 : f32 to vector<16x16xf32>
    %89 = arith.mulf %88, %87 : vector<16x16xf32>
    %90 = arith.addf %84, %89 : vector<16x16xf32>
    %c15 = arith.constant 15 : index
    %91 = memref.load %arg1[%c15] : memref<74xf32, #tpu.memory_space<smem>>
    %c0_60 = arith.constant 0 : index
    %c1_61 = arith.constant 1 : index
    %c2_62 = arith.constant 2 : index
    %c0_63 = arith.constant 0 : index
    %92 = vector.load %arg2[%c0_60, %c1_61, %c2_62, %c0_63] : memref<1x4x18x18xf32, #tpu.memory_space<vmem>>, vector<1x1x16x16xf32>
    %93 = vector.shape_cast %92 : vector<1x1x16x16xf32> to vector<16x16xf32>
    %94 = vector.broadcast %91 : f32 to vector<16x16xf32>
    %95 = arith.mulf %94, %93 : vector<16x16xf32>
    %96 = arith.addf %90, %95 : vector<16x16xf32>
    %c16 = arith.constant 16 : index
    %97 = memref.load %arg1[%c16] : memref<74xf32, #tpu.memory_space<smem>>
    %c0_64 = arith.constant 0 : index
    %c1_65 = arith.constant 1 : index
    %c2_66 = arith.constant 2 : index
    %c1_67 = arith.constant 1 : index
    %98 = vector.load %arg2[%c0_64, %c1_65, %c2_66, %c1_67] : memref<1x4x18x18xf32, #tpu.memory_space<vmem>>, vector<1x1x16x16xf32>
    %99 = vector.shape_cast %98 : vector<1x1x16x16xf32> to vector<16x16xf32>
    %100 = vector.broadcast %97 : f32 to vector<16x16xf32>
    %101 = arith.mulf %100, %99 : vector<16x16xf32>
    %102 = arith.addf %96, %101 : vector<16x16xf32>
    %c17 = arith.constant 17 : index
    %103 = memref.load %arg1[%c17] : memref<74xf32, #tpu.memory_space<smem>>
    %c0_68 = arith.constant 0 : index
    %c1_69 = arith.constant 1 : index
    %c2_70 = arith.constant 2 : index
    %c2_71 = arith.constant 2 : index
    %104 = vector.load %arg2[%c0_68, %c1_69, %c2_70, %c2_71] : memref<1x4x18x18xf32, #tpu.memory_space<vmem>>, vector<1x1x16x16xf32>
    %105 = vector.shape_cast %104 : vector<1x1x16x16xf32> to vector<16x16xf32>
    %106 = vector.broadcast %103 : f32 to vector<16x16xf32>
    %107 = arith.mulf %106, %105 : vector<16x16xf32>
    %108 = arith.addf %102, %107 : vector<16x16xf32>
    %c18 = arith.constant 18 : index
    %109 = memref.load %arg1[%c18] : memref<74xf32, #tpu.memory_space<smem>>
    %c0_72 = arith.constant 0 : index
    %c2_73 = arith.constant 2 : index
    %c0_74 = arith.constant 0 : index
    %c0_75 = arith.constant 0 : index
    %110 = vector.load %arg2[%c0_72, %c2_73, %c0_74, %c0_75] : memref<1x4x18x18xf32, #tpu.memory_space<vmem>>, vector<1x1x16x16xf32>
    %111 = vector.shape_cast %110 : vector<1x1x16x16xf32> to vector<16x16xf32>
    %112 = vector.broadcast %109 : f32 to vector<16x16xf32>
    %113 = arith.mulf %112, %111 : vector<16x16xf32>
    %114 = arith.addf %108, %113 : vector<16x16xf32>
    %c19 = arith.constant 19 : index
    %115 = memref.load %arg1[%c19] : memref<74xf32, #tpu.memory_space<smem>>
    %c0_76 = arith.constant 0 : index
    %c2_77 = arith.constant 2 : index
    %c0_78 = arith.constant 0 : index
    %c1_79 = arith.constant 1 : index
    %116 = vector.load %arg2[%c0_76, %c2_77, %c0_78, %c1_79] : memref<1x4x18x18xf32, #tpu.memory_space<vmem>>, vector<1x1x16x16xf32>
    %117 = vector.shape_cast %116 : vector<1x1x16x16xf32> to vector<16x16xf32>
    %118 = vector.broadcast %115 : f32 to vector<16x16xf32>
    %119 = arith.mulf %118, %117 : vector<16x16xf32>
    %120 = arith.addf %114, %119 : vector<16x16xf32>
    %c20 = arith.constant 20 : index
    %121 = memref.load %arg1[%c20] : memref<74xf32, #tpu.memory_space<smem>>
    %c0_80 = arith.constant 0 : index
    %c2_81 = arith.constant 2 : index
    %c0_82 = arith.constant 0 : index
    %c2_83 = arith.constant 2 : index
    %122 = vector.load %arg2[%c0_80, %c2_81, %c0_82, %c2_83] : memref<1x4x18x18xf32, #tpu.memory_space<vmem>>, vector<1x1x16x16xf32>
    %123 = vector.shape_cast %122 : vector<1x1x16x16xf32> to vector<16x16xf32>
    %124 = vector.broadcast %121 : f32 to vector<16x16xf32>
    %125 = arith.mulf %124, %123 : vector<16x16xf32>
    %126 = arith.addf %120, %125 : vector<16x16xf32>
    %c21 = arith.constant 21 : index
    %127 = memref.load %arg1[%c21] : memref<74xf32, #tpu.memory_space<smem>>
    %c0_84 = arith.constant 0 : index
    %c2_85 = arith.constant 2 : index
    %c1_86 = arith.constant 1 : index
    %c0_87 = arith.constant 0 : index
    %128 = vector.load %arg2[%c0_84, %c2_85, %c1_86, %c0_87] : memref<1x4x18x18xf32, #tpu.memory_space<vmem>>, vector<1x1x16x16xf32>
    %129 = vector.shape_cast %128 : vector<1x1x16x16xf32> to vector<16x16xf32>
    %130 = vector.broadcast %127 : f32 to vector<16x16xf32>
    %131 = arith.mulf %130, %129 : vector<16x16xf32>
    %132 = arith.addf %126, %131 : vector<16x16xf32>
    %c22 = arith.constant 22 : index
    %133 = memref.load %arg1[%c22] : memref<74xf32, #tpu.memory_space<smem>>
    %c0_88 = arith.constant 0 : index
    %c2_89 = arith.constant 2 : index
    %c1_90 = arith.constant 1 : index
    %c1_91 = arith.constant 1 : index
    %134 = vector.load %arg2[%c0_88, %c2_89, %c1_90, %c1_91] : memref<1x4x18x18xf32, #tpu.memory_space<vmem>>, vector<1x1x16x16xf32>
    %135 = vector.shape_cast %134 : vector<1x1x16x16xf32> to vector<16x16xf32>
    %136 = vector.broadcast %133 : f32 to vector<16x16xf32>
    %137 = arith.mulf %136, %135 : vector<16x16xf32>
    %138 = arith.addf %132, %137 : vector<16x16xf32>
    %c23 = arith.constant 23 : index
    %139 = memref.load %arg1[%c23] : memref<74xf32, #tpu.memory_space<smem>>
    %c0_92 = arith.constant 0 : index
    %c2_93 = arith.constant 2 : index
    %c1_94 = arith.constant 1 : index
    %c2_95 = arith.constant 2 : index
    %140 = vector.load %arg2[%c0_92, %c2_93, %c1_94, %c2_95] : memref<1x4x18x18xf32, #tpu.memory_space<vmem>>, vector<1x1x16x16xf32>
    %141 = vector.shape_cast %140 : vector<1x1x16x16xf32> to vector<16x16xf32>
    %142 = vector.broadcast %139 : f32 to vector<16x16xf32>
    %143 = arith.mulf %142, %141 : vector<16x16xf32>
    %144 = arith.addf %138, %143 : vector<16x16xf32>
    %c24 = arith.constant 24 : index
    %145 = memref.load %arg1[%c24] : memref<74xf32, #tpu.memory_space<smem>>
    %c0_96 = arith.constant 0 : index
    %c2_97 = arith.constant 2 : index
    %c2_98 = arith.constant 2 : index
    %c0_99 = arith.constant 0 : index
    %146 = vector.load %arg2[%c0_96, %c2_97, %c2_98, %c0_99] : memref<1x4x18x18xf32, #tpu.memory_space<vmem>>, vector<1x1x16x16xf32>
    %147 = vector.shape_cast %146 : vector<1x1x16x16xf32> to vector<16x16xf32>
    %148 = vector.broadcast %145 : f32 to vector<16x16xf32>
    %149 = arith.mulf %148, %147 : vector<16x16xf32>
    %150 = arith.addf %144, %149 : vector<16x16xf32>
    %c25 = arith.constant 25 : index
    %151 = memref.load %arg1[%c25] : memref<74xf32, #tpu.memory_space<smem>>
    %c0_100 = arith.constant 0 : index
    %c2_101 = arith.constant 2 : index
    %c2_102 = arith.constant 2 : index
    %c1_103 = arith.constant 1 : index
    %152 = vector.load %arg2[%c0_100, %c2_101, %c2_102, %c1_103] : memref<1x4x18x18xf32, #tpu.memory_space<vmem>>, vector<1x1x16x16xf32>
    %153 = vector.shape_cast %152 : vector<1x1x16x16xf32> to vector<16x16xf32>
    %154 = vector.broadcast %151 : f32 to vector<16x16xf32>
    %155 = arith.mulf %154, %153 : vector<16x16xf32>
    %156 = arith.addf %150, %155 : vector<16x16xf32>
    %c26 = arith.constant 26 : index
    %157 = memref.load %arg1[%c26] : memref<74xf32, #tpu.memory_space<smem>>
    %c0_104 = arith.constant 0 : index
    %c2_105 = arith.constant 2 : index
    %c2_106 = arith.constant 2 : index
    %c2_107 = arith.constant 2 : index
    %158 = vector.load %arg2[%c0_104, %c2_105, %c2_106, %c2_107] : memref<1x4x18x18xf32, #tpu.memory_space<vmem>>, vector<1x1x16x16xf32>
    %159 = vector.shape_cast %158 : vector<1x1x16x16xf32> to vector<16x16xf32>
    %160 = vector.broadcast %157 : f32 to vector<16x16xf32>
    %161 = arith.mulf %160, %159 : vector<16x16xf32>
    %162 = arith.addf %156, %161 : vector<16x16xf32>
    %c27 = arith.constant 27 : index
    %163 = memref.load %arg1[%c27] : memref<74xf32, #tpu.memory_space<smem>>
    %c0_108 = arith.constant 0 : index
    %c3_109 = arith.constant 3 : index
    %c0_110 = arith.constant 0 : index
    %c0_111 = arith.constant 0 : index
    %164 = vector.load %arg2[%c0_108, %c3_109, %c0_110, %c0_111] : memref<1x4x18x18xf32, #tpu.memory_space<vmem>>, vector<1x1x16x16xf32>
    %165 = vector.shape_cast %164 : vector<1x1x16x16xf32> to vector<16x16xf32>
    %166 = vector.broadcast %163 : f32 to vector<16x16xf32>
    %167 = arith.mulf %166, %165 : vector<16x16xf32>
    %168 = arith.addf %162, %167 : vector<16x16xf32>
    %c28 = arith.constant 28 : index
    %169 = memref.load %arg1[%c28] : memref<74xf32, #tpu.memory_space<smem>>
    %c0_112 = arith.constant 0 : index
    %c3_113 = arith.constant 3 : index
    %c0_114 = arith.constant 0 : index
    %c1_115 = arith.constant 1 : index
    %170 = vector.load %arg2[%c0_112, %c3_113, %c0_114, %c1_115] : memref<1x4x18x18xf32, #tpu.memory_space<vmem>>, vector<1x1x16x16xf32>
    %171 = vector.shape_cast %170 : vector<1x1x16x16xf32> to vector<16x16xf32>
    %172 = vector.broadcast %169 : f32 to vector<16x16xf32>
    %173 = arith.mulf %172, %171 : vector<16x16xf32>
    %174 = arith.addf %168, %173 : vector<16x16xf32>
    %c29 = arith.constant 29 : index
    %175 = memref.load %arg1[%c29] : memref<74xf32, #tpu.memory_space<smem>>
    %c0_116 = arith.constant 0 : index
    %c3_117 = arith.constant 3 : index
    %c0_118 = arith.constant 0 : index
    %c2_119 = arith.constant 2 : index
    %176 = vector.load %arg2[%c0_116, %c3_117, %c0_118, %c2_119] : memref<1x4x18x18xf32, #tpu.memory_space<vmem>>, vector<1x1x16x16xf32>
    %177 = vector.shape_cast %176 : vector<1x1x16x16xf32> to vector<16x16xf32>
    %178 = vector.broadcast %175 : f32 to vector<16x16xf32>
    %179 = arith.mulf %178, %177 : vector<16x16xf32>
    %180 = arith.addf %174, %179 : vector<16x16xf32>
    %c30 = arith.constant 30 : index
    %181 = memref.load %arg1[%c30] : memref<74xf32, #tpu.memory_space<smem>>
    %c0_120 = arith.constant 0 : index
    %c3_121 = arith.constant 3 : index
    %c1_122 = arith.constant 1 : index
    %c0_123 = arith.constant 0 : index
    %182 = vector.load %arg2[%c0_120, %c3_121, %c1_122, %c0_123] : memref<1x4x18x18xf32, #tpu.memory_space<vmem>>, vector<1x1x16x16xf32>
    %183 = vector.shape_cast %182 : vector<1x1x16x16xf32> to vector<16x16xf32>
    %184 = vector.broadcast %181 : f32 to vector<16x16xf32>
    %185 = arith.mulf %184, %183 : vector<16x16xf32>
    %186 = arith.addf %180, %185 : vector<16x16xf32>
    %c31 = arith.constant 31 : index
    %187 = memref.load %arg1[%c31] : memref<74xf32, #tpu.memory_space<smem>>
    %c0_124 = arith.constant 0 : index
    %c3_125 = arith.constant 3 : index
    %c1_126 = arith.constant 1 : index
    %c1_127 = arith.constant 1 : index
    %188 = vector.load %arg2[%c0_124, %c3_125, %c1_126, %c1_127] : memref<1x4x18x18xf32, #tpu.memory_space<vmem>>, vector<1x1x16x16xf32>
    %189 = vector.shape_cast %188 : vector<1x1x16x16xf32> to vector<16x16xf32>
    %190 = vector.broadcast %187 : f32 to vector<16x16xf32>
    %191 = arith.mulf %190, %189 : vector<16x16xf32>
    %192 = arith.addf %186, %191 : vector<16x16xf32>
    %c32 = arith.constant 32 : index
    %193 = memref.load %arg1[%c32] : memref<74xf32, #tpu.memory_space<smem>>
    %c0_128 = arith.constant 0 : index
    %c3_129 = arith.constant 3 : index
    %c1_130 = arith.constant 1 : index
    %c2_131 = arith.constant 2 : index
    %194 = vector.load %arg2[%c0_128, %c3_129, %c1_130, %c2_131] : memref<1x4x18x18xf32, #tpu.memory_space<vmem>>, vector<1x1x16x16xf32>
    %195 = vector.shape_cast %194 : vector<1x1x16x16xf32> to vector<16x16xf32>
    %196 = vector.broadcast %193 : f32 to vector<16x16xf32>
    %197 = arith.mulf %196, %195 : vector<16x16xf32>
    %198 = arith.addf %192, %197 : vector<16x16xf32>
    %c33 = arith.constant 33 : index
    %199 = memref.load %arg1[%c33] : memref<74xf32, #tpu.memory_space<smem>>
    %c0_132 = arith.constant 0 : index
    %c3_133 = arith.constant 3 : index
    %c2_134 = arith.constant 2 : index
    %c0_135 = arith.constant 0 : index
    %200 = vector.load %arg2[%c0_132, %c3_133, %c2_134, %c0_135] : memref<1x4x18x18xf32, #tpu.memory_space<vmem>>, vector<1x1x16x16xf32>
    %201 = vector.shape_cast %200 : vector<1x1x16x16xf32> to vector<16x16xf32>
    %202 = vector.broadcast %199 : f32 to vector<16x16xf32>
    %203 = arith.mulf %202, %201 : vector<16x16xf32>
    %204 = arith.addf %198, %203 : vector<16x16xf32>
    %c34 = arith.constant 34 : index
    %205 = memref.load %arg1[%c34] : memref<74xf32, #tpu.memory_space<smem>>
    %c0_136 = arith.constant 0 : index
    %c3_137 = arith.constant 3 : index
    %c2_138 = arith.constant 2 : index
    %c1_139 = arith.constant 1 : index
    %206 = vector.load %arg2[%c0_136, %c3_137, %c2_138, %c1_139] : memref<1x4x18x18xf32, #tpu.memory_space<vmem>>, vector<1x1x16x16xf32>
    %207 = vector.shape_cast %206 : vector<1x1x16x16xf32> to vector<16x16xf32>
    %208 = vector.broadcast %205 : f32 to vector<16x16xf32>
    %209 = arith.mulf %208, %207 : vector<16x16xf32>
    %210 = arith.addf %204, %209 : vector<16x16xf32>
    %c35 = arith.constant 35 : index
    %211 = memref.load %arg1[%c35] : memref<74xf32, #tpu.memory_space<smem>>
    %c0_140 = arith.constant 0 : index
    %c3_141 = arith.constant 3 : index
    %c2_142 = arith.constant 2 : index
    %c2_143 = arith.constant 2 : index
    %212 = vector.load %arg2[%c0_140, %c3_141, %c2_142, %c2_143] : memref<1x4x18x18xf32, #tpu.memory_space<vmem>>, vector<1x1x16x16xf32>
    %213 = vector.shape_cast %212 : vector<1x1x16x16xf32> to vector<16x16xf32>
    %214 = vector.broadcast %211 : f32 to vector<16x16xf32>
    %215 = arith.mulf %214, %213 : vector<16x16xf32>
    %216 = arith.addf %210, %215 : vector<16x16xf32>
    %c72 = arith.constant 72 : index
    %217 = memref.load %arg1[%c72] : memref<74xf32, #tpu.memory_space<smem>>
    %218 = vector.broadcast %217 : f32 to vector<16x16xf32>
    %219 = arith.addf %216, %218 : vector<16x16xf32>
    %220 = arith.mulf %219, %219 : vector<16x16xf32>
    %cst_144 = arith.constant dense<0.000000e+00> : vector<16xf32>
    %221 = vector.multi_reduction <add>, %220, %cst_144 [1] : vector<16x16xf32> to vector<16xf32>
    %222 = vector.shape_cast %221 : vector<16xf32> to vector<16x1xf32>
    %cst_145 = arith.constant dense<0.000000e+00> : vector<1xf32>
    %223 = vector.multi_reduction <add>, %222, %cst_145 [0] : vector<16x1xf32> to vector<1xf32>
    %224 = vector.shape_cast %223 : vector<1xf32> to vector<1x1xf32>
    %225 = vector.shape_cast %224 : vector<1x1xf32> to vector<1x1x1xf32>
    %cst_146 = arith.constant 3.906250e-03 : f32
    %226 = vector.broadcast %cst_146 : f32 to vector<1x1x1xf32>
    %227 = arith.mulf %226, %225 : vector<1x1x1xf32>
    %cst_147 = arith.constant 0.000000e+00 : f32
    %228 = vector.broadcast %cst_147 : f32 to vector<16x16xf32>
    %c36 = arith.constant 36 : index
    %229 = memref.load %arg1[%c36] : memref<74xf32, #tpu.memory_space<smem>>
    %c0_148 = arith.constant 0 : index
    %c0_149 = arith.constant 0 : index
    %c0_150 = arith.constant 0 : index
    %c0_151 = arith.constant 0 : index
    %230 = vector.load %arg3[%c0_148, %c0_149, %c0_150, %c0_151] : memref<1x4x18x18xf32, #tpu.memory_space<vmem>>, vector<1x1x16x16xf32>
    %231 = vector.shape_cast %230 : vector<1x1x16x16xf32> to vector<16x16xf32>
    %232 = vector.broadcast %229 : f32 to vector<16x16xf32>
    %233 = arith.mulf %232, %231 : vector<16x16xf32>
    %234 = arith.addf %228, %233 : vector<16x16xf32>
    %c37 = arith.constant 37 : index
    %235 = memref.load %arg1[%c37] : memref<74xf32, #tpu.memory_space<smem>>
    %c0_152 = arith.constant 0 : index
    %c0_153 = arith.constant 0 : index
    %c0_154 = arith.constant 0 : index
    %c1_155 = arith.constant 1 : index
    %236 = vector.load %arg3[%c0_152, %c0_153, %c0_154, %c1_155] : memref<1x4x18x18xf32, #tpu.memory_space<vmem>>, vector<1x1x16x16xf32>
    %237 = vector.shape_cast %236 : vector<1x1x16x16xf32> to vector<16x16xf32>
    %238 = vector.broadcast %235 : f32 to vector<16x16xf32>
    %239 = arith.mulf %238, %237 : vector<16x16xf32>
    %240 = arith.addf %234, %239 : vector<16x16xf32>
    %c38 = arith.constant 38 : index
    %241 = memref.load %arg1[%c38] : memref<74xf32, #tpu.memory_space<smem>>
    %c0_156 = arith.constant 0 : index
    %c0_157 = arith.constant 0 : index
    %c0_158 = arith.constant 0 : index
    %c2_159 = arith.constant 2 : index
    %242 = vector.load %arg3[%c0_156, %c0_157, %c0_158, %c2_159] : memref<1x4x18x18xf32, #tpu.memory_space<vmem>>, vector<1x1x16x16xf32>
    %243 = vector.shape_cast %242 : vector<1x1x16x16xf32> to vector<16x16xf32>
    %244 = vector.broadcast %241 : f32 to vector<16x16xf32>
    %245 = arith.mulf %244, %243 : vector<16x16xf32>
    %246 = arith.addf %240, %245 : vector<16x16xf32>
    %c39 = arith.constant 39 : index
    %247 = memref.load %arg1[%c39] : memref<74xf32, #tpu.memory_space<smem>>
    %c0_160 = arith.constant 0 : index
    %c0_161 = arith.constant 0 : index
    %c1_162 = arith.constant 1 : index
    %c0_163 = arith.constant 0 : index
    %248 = vector.load %arg3[%c0_160, %c0_161, %c1_162, %c0_163] : memref<1x4x18x18xf32, #tpu.memory_space<vmem>>, vector<1x1x16x16xf32>
    %249 = vector.shape_cast %248 : vector<1x1x16x16xf32> to vector<16x16xf32>
    %250 = vector.broadcast %247 : f32 to vector<16x16xf32>
    %251 = arith.mulf %250, %249 : vector<16x16xf32>
    %252 = arith.addf %246, %251 : vector<16x16xf32>
    %c40 = arith.constant 40 : index
    %253 = memref.load %arg1[%c40] : memref<74xf32, #tpu.memory_space<smem>>
    %c0_164 = arith.constant 0 : index
    %c0_165 = arith.constant 0 : index
    %c1_166 = arith.constant 1 : index
    %c1_167 = arith.constant 1 : index
    %254 = vector.load %arg3[%c0_164, %c0_165, %c1_166, %c1_167] : memref<1x4x18x18xf32, #tpu.memory_space<vmem>>, vector<1x1x16x16xf32>
    %255 = vector.shape_cast %254 : vector<1x1x16x16xf32> to vector<16x16xf32>
    %256 = vector.broadcast %253 : f32 to vector<16x16xf32>
    %257 = arith.mulf %256, %255 : vector<16x16xf32>
    %258 = arith.addf %252, %257 : vector<16x16xf32>
    %c41 = arith.constant 41 : index
    %259 = memref.load %arg1[%c41] : memref<74xf32, #tpu.memory_space<smem>>
    %c0_168 = arith.constant 0 : index
    %c0_169 = arith.constant 0 : index
    %c1_170 = arith.constant 1 : index
    %c2_171 = arith.constant 2 : index
    %260 = vector.load %arg3[%c0_168, %c0_169, %c1_170, %c2_171] : memref<1x4x18x18xf32, #tpu.memory_space<vmem>>, vector<1x1x16x16xf32>
    %261 = vector.shape_cast %260 : vector<1x1x16x16xf32> to vector<16x16xf32>
    %262 = vector.broadcast %259 : f32 to vector<16x16xf32>
    %263 = arith.mulf %262, %261 : vector<16x16xf32>
    %264 = arith.addf %258, %263 : vector<16x16xf32>
    %c42 = arith.constant 42 : index
    %265 = memref.load %arg1[%c42] : memref<74xf32, #tpu.memory_space<smem>>
    %c0_172 = arith.constant 0 : index
    %c0_173 = arith.constant 0 : index
    %c2_174 = arith.constant 2 : index
    %c0_175 = arith.constant 0 : index
    %266 = vector.load %arg3[%c0_172, %c0_173, %c2_174, %c0_175] : memref<1x4x18x18xf32, #tpu.memory_space<vmem>>, vector<1x1x16x16xf32>
    %267 = vector.shape_cast %266 : vector<1x1x16x16xf32> to vector<16x16xf32>
    %268 = vector.broadcast %265 : f32 to vector<16x16xf32>
    %269 = arith.mulf %268, %267 : vector<16x16xf32>
    %270 = arith.addf %264, %269 : vector<16x16xf32>
    %c43 = arith.constant 43 : index
    %271 = memref.load %arg1[%c43] : memref<74xf32, #tpu.memory_space<smem>>
    %c0_176 = arith.constant 0 : index
    %c0_177 = arith.constant 0 : index
    %c2_178 = arith.constant 2 : index
    %c1_179 = arith.constant 1 : index
    %272 = vector.load %arg3[%c0_176, %c0_177, %c2_178, %c1_179] : memref<1x4x18x18xf32, #tpu.memory_space<vmem>>, vector<1x1x16x16xf32>
    %273 = vector.shape_cast %272 : vector<1x1x16x16xf32> to vector<16x16xf32>
    %274 = vector.broadcast %271 : f32 to vector<16x16xf32>
    %275 = arith.mulf %274, %273 : vector<16x16xf32>
    %276 = arith.addf %270, %275 : vector<16x16xf32>
    %c44 = arith.constant 44 : index
    %277 = memref.load %arg1[%c44] : memref<74xf32, #tpu.memory_space<smem>>
    %c0_180 = arith.constant 0 : index
    %c0_181 = arith.constant 0 : index
    %c2_182 = arith.constant 2 : index
    %c2_183 = arith.constant 2 : index
    %278 = vector.load %arg3[%c0_180, %c0_181, %c2_182, %c2_183] : memref<1x4x18x18xf32, #tpu.memory_space<vmem>>, vector<1x1x16x16xf32>
    %279 = vector.shape_cast %278 : vector<1x1x16x16xf32> to vector<16x16xf32>
    %280 = vector.broadcast %277 : f32 to vector<16x16xf32>
    %281 = arith.mulf %280, %279 : vector<16x16xf32>
    %282 = arith.addf %276, %281 : vector<16x16xf32>
    %c45 = arith.constant 45 : index
    %283 = memref.load %arg1[%c45] : memref<74xf32, #tpu.memory_space<smem>>
    %c0_184 = arith.constant 0 : index
    %c1_185 = arith.constant 1 : index
    %c0_186 = arith.constant 0 : index
    %c0_187 = arith.constant 0 : index
    %284 = vector.load %arg3[%c0_184, %c1_185, %c0_186, %c0_187] : memref<1x4x18x18xf32, #tpu.memory_space<vmem>>, vector<1x1x16x16xf32>
    %285 = vector.shape_cast %284 : vector<1x1x16x16xf32> to vector<16x16xf32>
    %286 = vector.broadcast %283 : f32 to vector<16x16xf32>
    %287 = arith.mulf %286, %285 : vector<16x16xf32>
    %288 = arith.addf %282, %287 : vector<16x16xf32>
    %c46 = arith.constant 46 : index
    %289 = memref.load %arg1[%c46] : memref<74xf32, #tpu.memory_space<smem>>
    %c0_188 = arith.constant 0 : index
    %c1_189 = arith.constant 1 : index
    %c0_190 = arith.constant 0 : index
    %c1_191 = arith.constant 1 : index
    %290 = vector.load %arg3[%c0_188, %c1_189, %c0_190, %c1_191] : memref<1x4x18x18xf32, #tpu.memory_space<vmem>>, vector<1x1x16x16xf32>
    %291 = vector.shape_cast %290 : vector<1x1x16x16xf32> to vector<16x16xf32>
    %292 = vector.broadcast %289 : f32 to vector<16x16xf32>
    %293 = arith.mulf %292, %291 : vector<16x16xf32>
    %294 = arith.addf %288, %293 : vector<16x16xf32>
    %c47 = arith.constant 47 : index
    %295 = memref.load %arg1[%c47] : memref<74xf32, #tpu.memory_space<smem>>
    %c0_192 = arith.constant 0 : index
    %c1_193 = arith.constant 1 : index
    %c0_194 = arith.constant 0 : index
    %c2_195 = arith.constant 2 : index
    %296 = vector.load %arg3[%c0_192, %c1_193, %c0_194, %c2_195] : memref<1x4x18x18xf32, #tpu.memory_space<vmem>>, vector<1x1x16x16xf32>
    %297 = vector.shape_cast %296 : vector<1x1x16x16xf32> to vector<16x16xf32>
    %298 = vector.broadcast %295 : f32 to vector<16x16xf32>
    %299 = arith.mulf %298, %297 : vector<16x16xf32>
    %300 = arith.addf %294, %299 : vector<16x16xf32>
    %c48 = arith.constant 48 : index
    %301 = memref.load %arg1[%c48] : memref<74xf32, #tpu.memory_space<smem>>
    %c0_196 = arith.constant 0 : index
    %c1_197 = arith.constant 1 : index
    %c1_198 = arith.constant 1 : index
    %c0_199 = arith.constant 0 : index
    %302 = vector.load %arg3[%c0_196, %c1_197, %c1_198, %c0_199] : memref<1x4x18x18xf32, #tpu.memory_space<vmem>>, vector<1x1x16x16xf32>
    %303 = vector.shape_cast %302 : vector<1x1x16x16xf32> to vector<16x16xf32>
    %304 = vector.broadcast %301 : f32 to vector<16x16xf32>
    %305 = arith.mulf %304, %303 : vector<16x16xf32>
    %306 = arith.addf %300, %305 : vector<16x16xf32>
    %c49 = arith.constant 49 : index
    %307 = memref.load %arg1[%c49] : memref<74xf32, #tpu.memory_space<smem>>
    %c0_200 = arith.constant 0 : index
    %c1_201 = arith.constant 1 : index
    %c1_202 = arith.constant 1 : index
    %c1_203 = arith.constant 1 : index
    %308 = vector.load %arg3[%c0_200, %c1_201, %c1_202, %c1_203] : memref<1x4x18x18xf32, #tpu.memory_space<vmem>>, vector<1x1x16x16xf32>
    %309 = vector.shape_cast %308 : vector<1x1x16x16xf32> to vector<16x16xf32>
    %310 = vector.broadcast %307 : f32 to vector<16x16xf32>
    %311 = arith.mulf %310, %309 : vector<16x16xf32>
    %312 = arith.addf %306, %311 : vector<16x16xf32>
    %c50 = arith.constant 50 : index
    %313 = memref.load %arg1[%c50] : memref<74xf32, #tpu.memory_space<smem>>
    %c0_204 = arith.constant 0 : index
    %c1_205 = arith.constant 1 : index
    %c1_206 = arith.constant 1 : index
    %c2_207 = arith.constant 2 : index
    %314 = vector.load %arg3[%c0_204, %c1_205, %c1_206, %c2_207] : memref<1x4x18x18xf32, #tpu.memory_space<vmem>>, vector<1x1x16x16xf32>
    %315 = vector.shape_cast %314 : vector<1x1x16x16xf32> to vector<16x16xf32>
    %316 = vector.broadcast %313 : f32 to vector<16x16xf32>
    %317 = arith.mulf %316, %315 : vector<16x16xf32>
    %318 = arith.addf %312, %317 : vector<16x16xf32>
    %c51 = arith.constant 51 : index
    %319 = memref.load %arg1[%c51] : memref<74xf32, #tpu.memory_space<smem>>
    %c0_208 = arith.constant 0 : index
    %c1_209 = arith.constant 1 : index
    %c2_210 = arith.constant 2 : index
    %c0_211 = arith.constant 0 : index
    %320 = vector.load %arg3[%c0_208, %c1_209, %c2_210, %c0_211] : memref<1x4x18x18xf32, #tpu.memory_space<vmem>>, vector<1x1x16x16xf32>
    %321 = vector.shape_cast %320 : vector<1x1x16x16xf32> to vector<16x16xf32>
    %322 = vector.broadcast %319 : f32 to vector<16x16xf32>
    %323 = arith.mulf %322, %321 : vector<16x16xf32>
    %324 = arith.addf %318, %323 : vector<16x16xf32>
    %c52 = arith.constant 52 : index
    %325 = memref.load %arg1[%c52] : memref<74xf32, #tpu.memory_space<smem>>
    %c0_212 = arith.constant 0 : index
    %c1_213 = arith.constant 1 : index
    %c2_214 = arith.constant 2 : index
    %c1_215 = arith.constant 1 : index
    %326 = vector.load %arg3[%c0_212, %c1_213, %c2_214, %c1_215] : memref<1x4x18x18xf32, #tpu.memory_space<vmem>>, vector<1x1x16x16xf32>
    %327 = vector.shape_cast %326 : vector<1x1x16x16xf32> to vector<16x16xf32>
    %328 = vector.broadcast %325 : f32 to vector<16x16xf32>
    %329 = arith.mulf %328, %327 : vector<16x16xf32>
    %330 = arith.addf %324, %329 : vector<16x16xf32>
    %c53 = arith.constant 53 : index
    %331 = memref.load %arg1[%c53] : memref<74xf32, #tpu.memory_space<smem>>
    %c0_216 = arith.constant 0 : index
    %c1_217 = arith.constant 1 : index
    %c2_218 = arith.constant 2 : index
    %c2_219 = arith.constant 2 : index
    %332 = vector.load %arg3[%c0_216, %c1_217, %c2_218, %c2_219] : memref<1x4x18x18xf32, #tpu.memory_space<vmem>>, vector<1x1x16x16xf32>
    %333 = vector.shape_cast %332 : vector<1x1x16x16xf32> to vector<16x16xf32>
    %334 = vector.broadcast %331 : f32 to vector<16x16xf32>
    %335 = arith.mulf %334, %333 : vector<16x16xf32>
    %336 = arith.addf %330, %335 : vector<16x16xf32>
    %c54 = arith.constant 54 : index
    %337 = memref.load %arg1[%c54] : memref<74xf32, #tpu.memory_space<smem>>
    %c0_220 = arith.constant 0 : index
    %c2_221 = arith.constant 2 : index
    %c0_222 = arith.constant 0 : index
    %c0_223 = arith.constant 0 : index
    %338 = vector.load %arg3[%c0_220, %c2_221, %c0_222, %c0_223] : memref<1x4x18x18xf32, #tpu.memory_space<vmem>>, vector<1x1x16x16xf32>
    %339 = vector.shape_cast %338 : vector<1x1x16x16xf32> to vector<16x16xf32>
    %340 = vector.broadcast %337 : f32 to vector<16x16xf32>
    %341 = arith.mulf %340, %339 : vector<16x16xf32>
    %342 = arith.addf %336, %341 : vector<16x16xf32>
    %c55 = arith.constant 55 : index
    %343 = memref.load %arg1[%c55] : memref<74xf32, #tpu.memory_space<smem>>
    %c0_224 = arith.constant 0 : index
    %c2_225 = arith.constant 2 : index
    %c0_226 = arith.constant 0 : index
    %c1_227 = arith.constant 1 : index
    %344 = vector.load %arg3[%c0_224, %c2_225, %c0_226, %c1_227] : memref<1x4x18x18xf32, #tpu.memory_space<vmem>>, vector<1x1x16x16xf32>
    %345 = vector.shape_cast %344 : vector<1x1x16x16xf32> to vector<16x16xf32>
    %346 = vector.broadcast %343 : f32 to vector<16x16xf32>
    %347 = arith.mulf %346, %345 : vector<16x16xf32>
    %348 = arith.addf %342, %347 : vector<16x16xf32>
    %c56 = arith.constant 56 : index
    %349 = memref.load %arg1[%c56] : memref<74xf32, #tpu.memory_space<smem>>
    %c0_228 = arith.constant 0 : index
    %c2_229 = arith.constant 2 : index
    %c0_230 = arith.constant 0 : index
    %c2_231 = arith.constant 2 : index
    %350 = vector.load %arg3[%c0_228, %c2_229, %c0_230, %c2_231] : memref<1x4x18x18xf32, #tpu.memory_space<vmem>>, vector<1x1x16x16xf32>
    %351 = vector.shape_cast %350 : vector<1x1x16x16xf32> to vector<16x16xf32>
    %352 = vector.broadcast %349 : f32 to vector<16x16xf32>
    %353 = arith.mulf %352, %351 : vector<16x16xf32>
    %354 = arith.addf %348, %353 : vector<16x16xf32>
    %c57 = arith.constant 57 : index
    %355 = memref.load %arg1[%c57] : memref<74xf32, #tpu.memory_space<smem>>
    %c0_232 = arith.constant 0 : index
    %c2_233 = arith.constant 2 : index
    %c1_234 = arith.constant 1 : index
    %c0_235 = arith.constant 0 : index
    %356 = vector.load %arg3[%c0_232, %c2_233, %c1_234, %c0_235] : memref<1x4x18x18xf32, #tpu.memory_space<vmem>>, vector<1x1x16x16xf32>
    %357 = vector.shape_cast %356 : vector<1x1x16x16xf32> to vector<16x16xf32>
    %358 = vector.broadcast %355 : f32 to vector<16x16xf32>
    %359 = arith.mulf %358, %357 : vector<16x16xf32>
    %360 = arith.addf %354, %359 : vector<16x16xf32>
    %c58 = arith.constant 58 : index
    %361 = memref.load %arg1[%c58] : memref<74xf32, #tpu.memory_space<smem>>
    %c0_236 = arith.constant 0 : index
    %c2_237 = arith.constant 2 : index
    %c1_238 = arith.constant 1 : index
    %c1_239 = arith.constant 1 : index
    %362 = vector.load %arg3[%c0_236, %c2_237, %c1_238, %c1_239] : memref<1x4x18x18xf32, #tpu.memory_space<vmem>>, vector<1x1x16x16xf32>
    %363 = vector.shape_cast %362 : vector<1x1x16x16xf32> to vector<16x16xf32>
    %364 = vector.broadcast %361 : f32 to vector<16x16xf32>
    %365 = arith.mulf %364, %363 : vector<16x16xf32>
    %366 = arith.addf %360, %365 : vector<16x16xf32>
    %c59 = arith.constant 59 : index
    %367 = memref.load %arg1[%c59] : memref<74xf32, #tpu.memory_space<smem>>
    %c0_240 = arith.constant 0 : index
    %c2_241 = arith.constant 2 : index
    %c1_242 = arith.constant 1 : index
    %c2_243 = arith.constant 2 : index
    %368 = vector.load %arg3[%c0_240, %c2_241, %c1_242, %c2_243] : memref<1x4x18x18xf32, #tpu.memory_space<vmem>>, vector<1x1x16x16xf32>
    %369 = vector.shape_cast %368 : vector<1x1x16x16xf32> to vector<16x16xf32>
    %370 = vector.broadcast %367 : f32 to vector<16x16xf32>
    %371 = arith.mulf %370, %369 : vector<16x16xf32>
    %372 = arith.addf %366, %371 : vector<16x16xf32>
    %c60 = arith.constant 60 : index
    %373 = memref.load %arg1[%c60] : memref<74xf32, #tpu.memory_space<smem>>
    %c0_244 = arith.constant 0 : index
    %c2_245 = arith.constant 2 : index
    %c2_246 = arith.constant 2 : index
    %c0_247 = arith.constant 0 : index
    %374 = vector.load %arg3[%c0_244, %c2_245, %c2_246, %c0_247] : memref<1x4x18x18xf32, #tpu.memory_space<vmem>>, vector<1x1x16x16xf32>
    %375 = vector.shape_cast %374 : vector<1x1x16x16xf32> to vector<16x16xf32>
    %376 = vector.broadcast %373 : f32 to vector<16x16xf32>
    %377 = arith.mulf %376, %375 : vector<16x16xf32>
    %378 = arith.addf %372, %377 : vector<16x16xf32>
    %c61 = arith.constant 61 : index
    %379 = memref.load %arg1[%c61] : memref<74xf32, #tpu.memory_space<smem>>
    %c0_248 = arith.constant 0 : index
    %c2_249 = arith.constant 2 : index
    %c2_250 = arith.constant 2 : index
    %c1_251 = arith.constant 1 : index
    %380 = vector.load %arg3[%c0_248, %c2_249, %c2_250, %c1_251] : memref<1x4x18x18xf32, #tpu.memory_space<vmem>>, vector<1x1x16x16xf32>
    %381 = vector.shape_cast %380 : vector<1x1x16x16xf32> to vector<16x16xf32>
    %382 = vector.broadcast %379 : f32 to vector<16x16xf32>
    %383 = arith.mulf %382, %381 : vector<16x16xf32>
    %384 = arith.addf %378, %383 : vector<16x16xf32>
    %c62 = arith.constant 62 : index
    %385 = memref.load %arg1[%c62] : memref<74xf32, #tpu.memory_space<smem>>
    %c0_252 = arith.constant 0 : index
    %c2_253 = arith.constant 2 : index
    %c2_254 = arith.constant 2 : index
    %c2_255 = arith.constant 2 : index
    %386 = vector.load %arg3[%c0_252, %c2_253, %c2_254, %c2_255] : memref<1x4x18x18xf32, #tpu.memory_space<vmem>>, vector<1x1x16x16xf32>
    %387 = vector.shape_cast %386 : vector<1x1x16x16xf32> to vector<16x16xf32>
    %388 = vector.broadcast %385 : f32 to vector<16x16xf32>
    %389 = arith.mulf %388, %387 : vector<16x16xf32>
    %390 = arith.addf %384, %389 : vector<16x16xf32>
    %c63 = arith.constant 63 : index
    %391 = memref.load %arg1[%c63] : memref<74xf32, #tpu.memory_space<smem>>
    %c0_256 = arith.constant 0 : index
    %c3_257 = arith.constant 3 : index
    %c0_258 = arith.constant 0 : index
    %c0_259 = arith.constant 0 : index
    %392 = vector.load %arg3[%c0_256, %c3_257, %c0_258, %c0_259] : memref<1x4x18x18xf32, #tpu.memory_space<vmem>>, vector<1x1x16x16xf32>
    %393 = vector.shape_cast %392 : vector<1x1x16x16xf32> to vector<16x16xf32>
    %394 = vector.broadcast %391 : f32 to vector<16x16xf32>
    %395 = arith.mulf %394, %393 : vector<16x16xf32>
    %396 = arith.addf %390, %395 : vector<16x16xf32>
    %c64 = arith.constant 64 : index
    %397 = memref.load %arg1[%c64] : memref<74xf32, #tpu.memory_space<smem>>
    %c0_260 = arith.constant 0 : index
    %c3_261 = arith.constant 3 : index
    %c0_262 = arith.constant 0 : index
    %c1_263 = arith.constant 1 : index
    %398 = vector.load %arg3[%c0_260, %c3_261, %c0_262, %c1_263] : memref<1x4x18x18xf32, #tpu.memory_space<vmem>>, vector<1x1x16x16xf32>
    %399 = vector.shape_cast %398 : vector<1x1x16x16xf32> to vector<16x16xf32>
    %400 = vector.broadcast %397 : f32 to vector<16x16xf32>
    %401 = arith.mulf %400, %399 : vector<16x16xf32>
    %402 = arith.addf %396, %401 : vector<16x16xf32>
    %c65 = arith.constant 65 : index
    %403 = memref.load %arg1[%c65] : memref<74xf32, #tpu.memory_space<smem>>
    %c0_264 = arith.constant 0 : index
    %c3_265 = arith.constant 3 : index
    %c0_266 = arith.constant 0 : index
    %c2_267 = arith.constant 2 : index
    %404 = vector.load %arg3[%c0_264, %c3_265, %c0_266, %c2_267] : memref<1x4x18x18xf32, #tpu.memory_space<vmem>>, vector<1x1x16x16xf32>
    %405 = vector.shape_cast %404 : vector<1x1x16x16xf32> to vector<16x16xf32>
    %406 = vector.broadcast %403 : f32 to vector<16x16xf32>
    %407 = arith.mulf %406, %405 : vector<16x16xf32>
    %408 = arith.addf %402, %407 : vector<16x16xf32>
    %c66 = arith.constant 66 : index
    %409 = memref.load %arg1[%c66] : memref<74xf32, #tpu.memory_space<smem>>
    %c0_268 = arith.constant 0 : index
    %c3_269 = arith.constant 3 : index
    %c1_270 = arith.constant 1 : index
    %c0_271 = arith.constant 0 : index
    %410 = vector.load %arg3[%c0_268, %c3_269, %c1_270, %c0_271] : memref<1x4x18x18xf32, #tpu.memory_space<vmem>>, vector<1x1x16x16xf32>
    %411 = vector.shape_cast %410 : vector<1x1x16x16xf32> to vector<16x16xf32>
    %412 = vector.broadcast %409 : f32 to vector<16x16xf32>
    %413 = arith.mulf %412, %411 : vector<16x16xf32>
    %414 = arith.addf %408, %413 : vector<16x16xf32>
    %c67 = arith.constant 67 : index
    %415 = memref.load %arg1[%c67] : memref<74xf32, #tpu.memory_space<smem>>
    %c0_272 = arith.constant 0 : index
    %c3_273 = arith.constant 3 : index
    %c1_274 = arith.constant 1 : index
    %c1_275 = arith.constant 1 : index
    %416 = vector.load %arg3[%c0_272, %c3_273, %c1_274, %c1_275] : memref<1x4x18x18xf32, #tpu.memory_space<vmem>>, vector<1x1x16x16xf32>
    %417 = vector.shape_cast %416 : vector<1x1x16x16xf32> to vector<16x16xf32>
    %418 = vector.broadcast %415 : f32 to vector<16x16xf32>
    %419 = arith.mulf %418, %417 : vector<16x16xf32>
    %420 = arith.addf %414, %419 : vector<16x16xf32>
    %c68 = arith.constant 68 : index
    %421 = memref.load %arg1[%c68] : memref<74xf32, #tpu.memory_space<smem>>
    %c0_276 = arith.constant 0 : index
    %c3_277 = arith.constant 3 : index
    %c1_278 = arith.constant 1 : index
    %c2_279 = arith.constant 2 : index
    %422 = vector.load %arg3[%c0_276, %c3_277, %c1_278, %c2_279] : memref<1x4x18x18xf32, #tpu.memory_space<vmem>>, vector<1x1x16x16xf32>
    %423 = vector.shape_cast %422 : vector<1x1x16x16xf32> to vector<16x16xf32>
    %424 = vector.broadcast %421 : f32 to vector<16x16xf32>
    %425 = arith.mulf %424, %423 : vector<16x16xf32>
    %426 = arith.addf %420, %425 : vector<16x16xf32>
    %c69 = arith.constant 69 : index
    %427 = memref.load %arg1[%c69] : memref<74xf32, #tpu.memory_space<smem>>
    %c0_280 = arith.constant 0 : index
    %c3_281 = arith.constant 3 : index
    %c2_282 = arith.constant 2 : index
    %c0_283 = arith.constant 0 : index
    %428 = vector.load %arg3[%c0_280, %c3_281, %c2_282, %c0_283] : memref<1x4x18x18xf32, #tpu.memory_space<vmem>>, vector<1x1x16x16xf32>
    %429 = vector.shape_cast %428 : vector<1x1x16x16xf32> to vector<16x16xf32>
    %430 = vector.broadcast %427 : f32 to vector<16x16xf32>
    %431 = arith.mulf %430, %429 : vector<16x16xf32>
    %432 = arith.addf %426, %431 : vector<16x16xf32>
    %c70 = arith.constant 70 : index
    %433 = memref.load %arg1[%c70] : memref<74xf32, #tpu.memory_space<smem>>
    %c0_284 = arith.constant 0 : index
    %c3_285 = arith.constant 3 : index
    %c2_286 = arith.constant 2 : index
    %c1_287 = arith.constant 1 : index
    %434 = vector.load %arg3[%c0_284, %c3_285, %c2_286, %c1_287] : memref<1x4x18x18xf32, #tpu.memory_space<vmem>>, vector<1x1x16x16xf32>
    %435 = vector.shape_cast %434 : vector<1x1x16x16xf32> to vector<16x16xf32>
    %436 = vector.broadcast %433 : f32 to vector<16x16xf32>
    %437 = arith.mulf %436, %435 : vector<16x16xf32>
    %438 = arith.addf %432, %437 : vector<16x16xf32>
    %c71 = arith.constant 71 : index
    %439 = memref.load %arg1[%c71] : memref<74xf32, #tpu.memory_space<smem>>
    %c0_288 = arith.constant 0 : index
    %c3_289 = arith.constant 3 : index
    %c2_290 = arith.constant 2 : index
    %c2_291 = arith.constant 2 : index
    %440 = vector.load %arg3[%c0_288, %c3_289, %c2_290, %c2_291] : memref<1x4x18x18xf32, #tpu.memory_space<vmem>>, vector<1x1x16x16xf32>
    %441 = vector.shape_cast %440 : vector<1x1x16x16xf32> to vector<16x16xf32>
    %442 = vector.broadcast %439 : f32 to vector<16x16xf32>
    %443 = arith.mulf %442, %441 : vector<16x16xf32>
    %444 = arith.addf %438, %443 : vector<16x16xf32>
    %c73 = arith.constant 73 : index
    %445 = memref.load %arg1[%c73] : memref<74xf32, #tpu.memory_space<smem>>
    %446 = vector.broadcast %445 : f32 to vector<16x16xf32>
    %447 = arith.addf %444, %446 : vector<16x16xf32>
    %448 = arith.mulf %447, %447 : vector<16x16xf32>
    %cst_292 = arith.constant dense<0.000000e+00> : vector<16xf32>
    %449 = vector.multi_reduction <add>, %448, %cst_292 [1] : vector<16x16xf32> to vector<16xf32>
    %450 = vector.shape_cast %449 : vector<16xf32> to vector<16x1xf32>
    %cst_293 = arith.constant dense<0.000000e+00> : vector<1xf32>
    %451 = vector.multi_reduction <add>, %450, %cst_293 [0] : vector<16x1xf32> to vector<1xf32>
    %452 = vector.shape_cast %451 : vector<1xf32> to vector<1x1xf32>
    %453 = vector.shape_cast %452 : vector<1x1xf32> to vector<1x1x1xf32>
    %cst_294 = arith.constant 3.906250e-03 : f32
    %454 = vector.broadcast %cst_294 : f32 to vector<1x1x1xf32>
    %455 = arith.mulf %454, %453 : vector<1x1x1xf32>
    %c0_295 = arith.constant 0 : index
    %c0_296 = arith.constant 0 : index
    %c0_297 = arith.constant 0 : index
    %456 = vector.load %arg4[%c0_295, %c0_296, %c0_297] : memref<1x8x128xf32, #tpu.memory_space<vmem>>, vector<1x8x128xf32>
    %c0_298 = arith.constant 0 : index
    %c0_299 = arith.constant 0 : index
    %c0_300 = arith.constant 0 : index
    %457 = vector.load %arg5[%c0_298, %c0_299, %c0_300] : memref<1x8x128xf32, #tpu.memory_space<vmem>>, vector<1x8x128xf32>
    %458 = arith.subf %456, %457 : vector<1x8x128xf32>
    %459 = math.absf %458 : vector<1x8x128xf32>
    %cst_301 = arith.constant dense<0.000000e+00> : vector<1x8xf32>
    %460 = vector.multi_reduction <add>, %459, %cst_301 [2] : vector<1x8x128xf32> to vector<1x8xf32>
    %461 = vector.shape_cast %460 : vector<1x8xf32> to vector<1x8x1xf32>
    %cst_302 = arith.constant dense<0.000000e+00> : vector<1x1xf32>
    %462 = vector.multi_reduction <add>, %461, %cst_302 [1] : vector<1x8x1xf32> to vector<1x1xf32>
    %463 = vector.shape_cast %462 : vector<1x1xf32> to vector<1x1x1xf32>
    %cst_303 = arith.constant 9.765625E-4 : f32
    %464 = vector.broadcast %cst_303 : f32 to vector<1x1x1xf32>
    %465 = arith.mulf %464, %463 : vector<1x1x1xf32>
    %c0_304 = arith.constant 0 : index
    %c0_305 = arith.constant 0 : index
    %c0_306 = arith.constant 0 : index
    %466 = vector.load %arg6[%c0_304, %c0_305, %c0_306] : memref<1x8x128xf32, #tpu.memory_space<vmem>>, vector<1x8x128xf32>
    %c0_307 = arith.constant 0 : index
    %c0_308 = arith.constant 0 : index
    %c0_309 = arith.constant 0 : index
    %467 = vector.load %arg7[%c0_307, %c0_308, %c0_309] : memref<1x8x128xf32, #tpu.memory_space<vmem>>, vector<1x8x128xf32>
    %468 = arith.subf %466, %467 : vector<1x8x128xf32>
    %469 = math.absf %468 : vector<1x8x128xf32>
    %cst_310 = arith.constant dense<0.000000e+00> : vector<1x8xf32>
    %470 = vector.multi_reduction <add>, %469, %cst_310 [2] : vector<1x8x128xf32> to vector<1x8xf32>
    %471 = vector.shape_cast %470 : vector<1x8xf32> to vector<1x8x1xf32>
    %cst_311 = arith.constant dense<0.000000e+00> : vector<1x1xf32>
    %472 = vector.multi_reduction <add>, %471, %cst_311 [1] : vector<1x8x1xf32> to vector<1x1xf32>
    %473 = vector.shape_cast %472 : vector<1x1xf32> to vector<1x1x1xf32>
    %cst_312 = arith.constant 9.765625E-4 : f32
    %474 = vector.broadcast %cst_312 : f32 to vector<1x1x1xf32>
    %475 = arith.mulf %474, %473 : vector<1x1x1xf32>
    %c0_313 = arith.constant 0 : index
    %c0_314 = arith.constant 0 : index
    %c0_315 = arith.constant 0 : index
    %476 = vector.load %arg8[%c0_313, %c0_314, %c0_315] : memref<1x1x128xf32, #tpu.memory_space<vmem>>, vector<1x1x128xf32>
    %c0_316 = arith.constant 0 : index
    %c0_317 = arith.constant 0 : index
    %c0_318 = arith.constant 0 : index
    %477 = vector.load %arg9[%c0_316, %c0_317, %c0_318] : memref<1x1x128xf32, #tpu.memory_space<vmem>>, vector<1x1x128xf32>
    %478 = arith.subf %476, %477 : vector<1x1x128xf32>
    %479 = math.absf %478 : vector<1x1x128xf32>
    %cst_319 = arith.constant dense<0.000000e+00> : vector<1x1xf32>
    %480 = vector.multi_reduction <add>, %479, %cst_319 [2] : vector<1x1x128xf32> to vector<1x1xf32>
    %481 = vector.shape_cast %480 : vector<1x1xf32> to vector<1x1x1xf32>
    %cst_320 = arith.constant dense<0.000000e+00> : vector<1x1xf32>
    %482 = vector.multi_reduction <add>, %481, %cst_320 [1] : vector<1x1x1xf32> to vector<1x1xf32>
    %483 = vector.shape_cast %482 : vector<1x1xf32> to vector<1x1x1xf32>
    %cst_321 = arith.constant 7.812500e-03 : f32
    %484 = vector.broadcast %cst_321 : f32 to vector<1x1x1xf32>
    %485 = arith.mulf %484, %483 : vector<1x1x1xf32>
    %c0_322 = arith.constant 0 : index
    %c0_323 = arith.constant 0 : index
    %c0_324 = arith.constant 0 : index
    %486 = vector.load %arg8[%c0_322, %c0_323, %c0_324] : memref<1x1x128xf32, #tpu.memory_space<vmem>>, vector<1x1x128xf32>
    %c0_325 = arith.constant 0 : index
    %c0_326 = arith.constant 0 : index
    %c0_327 = arith.constant 0 : index
    %487 = vector.load %arg10[%c0_325, %c0_326, %c0_327] : memref<1x1x128xf32, #tpu.memory_space<vmem>>, vector<1x1x128xf32>
    %488 = arith.subf %486, %487 : vector<1x1x128xf32>
    %489 = math.absf %488 : vector<1x1x128xf32>
    %cst_328 = arith.constant dense<0.000000e+00> : vector<1x1xf32>
    %490 = vector.multi_reduction <add>, %489, %cst_328 [2] : vector<1x1x128xf32> to vector<1x1xf32>
    %491 = vector.shape_cast %490 : vector<1x1xf32> to vector<1x1x1xf32>
    %cst_329 = arith.constant dense<0.000000e+00> : vector<1x1xf32>
    %492 = vector.multi_reduction <add>, %491, %cst_329 [1] : vector<1x1x1xf32> to vector<1x1xf32>
    %493 = vector.shape_cast %492 : vector<1x1xf32> to vector<1x1x1xf32>
    %c0_330 = arith.constant 0 : index
    %c0_331 = arith.constant 0 : index
    %c0_332 = arith.constant 0 : index
    %494 = vector.load %arg14[%c0_330, %c0_331, %c0_332] : memref<1x1x64xf32, #tpu.memory_space<vmem>>, vector<1x1x64xf32>
    %c0_333 = arith.constant 0 : index
    %c0_334 = arith.constant 0 : index
    %c0_335 = arith.constant 0 : index
    %495 = vector.load %arg15[%c0_333, %c0_334, %c0_335] : memref<1x1x64xf32, #tpu.memory_space<vmem>>, vector<1x1x64xf32>
    %496 = arith.subf %494, %495 : vector<1x1x64xf32>
    %497 = math.absf %496 : vector<1x1x64xf32>
    %cst_336 = arith.constant dense<0.000000e+00> : vector<1x1xf32>
    %498 = vector.multi_reduction <add>, %497, %cst_336 [2] : vector<1x1x64xf32> to vector<1x1xf32>
    %499 = vector.shape_cast %498 : vector<1x1xf32> to vector<1x1x1xf32>
    %cst_337 = arith.constant dense<0.000000e+00> : vector<1x1xf32>
    %500 = vector.multi_reduction <add>, %499, %cst_337 [1] : vector<1x1x1xf32> to vector<1x1xf32>
    %501 = vector.shape_cast %500 : vector<1x1xf32> to vector<1x1x1xf32>
    %502 = arith.addf %493, %501 : vector<1x1x1xf32>
    %cst_338 = arith.constant 0.00520833349 : f32
    %503 = vector.broadcast %cst_338 : f32 to vector<1x1x1xf32>
    %504 = arith.mulf %503, %502 : vector<1x1x1xf32>
    %c0_339 = arith.constant 0 : index
    %c0_340 = arith.constant 0 : index
    %c0_341 = arith.constant 0 : index
    %505 = vector.load %arg11[%c0_339, %c0_340, %c0_341] : memref<1x1x128xf32, #tpu.memory_space<vmem>>, vector<1x1x128xf32>
    %c0_342 = arith.constant 0 : index
    %c0_343 = arith.constant 0 : index
    %c0_344 = arith.constant 0 : index
    %506 = vector.load %arg12[%c0_342, %c0_343, %c0_344] : memref<1x1x128xf32, #tpu.memory_space<vmem>>, vector<1x1x128xf32>
    %507 = arith.subf %505, %506 : vector<1x1x128xf32>
    %508 = math.absf %507 : vector<1x1x128xf32>
    %cst_345 = arith.constant dense<0.000000e+00> : vector<1x1xf32>
    %509 = vector.multi_reduction <add>, %508, %cst_345 [2] : vector<1x1x128xf32> to vector<1x1xf32>
    %510 = vector.shape_cast %509 : vector<1x1xf32> to vector<1x1x1xf32>
    %cst_346 = arith.constant dense<0.000000e+00> : vector<1x1xf32>
    %511 = vector.multi_reduction <add>, %510, %cst_346 [1] : vector<1x1x1xf32> to vector<1x1xf32>
    %512 = vector.shape_cast %511 : vector<1x1xf32> to vector<1x1x1xf32>
    %cst_347 = arith.constant 7.812500e-03 : f32
    %513 = vector.broadcast %cst_347 : f32 to vector<1x1x1xf32>
    %514 = arith.mulf %513, %512 : vector<1x1x1xf32>
    %c0_348 = arith.constant 0 : index
    %c0_349 = arith.constant 0 : index
    %c0_350 = arith.constant 0 : index
    %515 = vector.load %arg11[%c0_348, %c0_349, %c0_350] : memref<1x1x128xf32, #tpu.memory_space<vmem>>, vector<1x1x128xf32>
    %c0_351 = arith.constant 0 : index
    %c0_352 = arith.constant 0 : index
    %c0_353 = arith.constant 0 : index
    %516 = vector.load %arg13[%c0_351, %c0_352, %c0_353] : memref<1x1x128xf32, #tpu.memory_space<vmem>>, vector<1x1x128xf32>
    %517 = arith.subf %515, %516 : vector<1x1x128xf32>
    %518 = math.absf %517 : vector<1x1x128xf32>
    %cst_354 = arith.constant dense<0.000000e+00> : vector<1x1xf32>
    %519 = vector.multi_reduction <add>, %518, %cst_354 [2] : vector<1x1x128xf32> to vector<1x1xf32>
    %520 = vector.shape_cast %519 : vector<1x1xf32> to vector<1x1x1xf32>
    %cst_355 = arith.constant dense<0.000000e+00> : vector<1x1xf32>
    %521 = vector.multi_reduction <add>, %520, %cst_355 [1] : vector<1x1x1xf32> to vector<1x1xf32>
    %522 = vector.shape_cast %521 : vector<1x1xf32> to vector<1x1x1xf32>
    %c0_356 = arith.constant 0 : index
    %c0_357 = arith.constant 0 : index
    %c0_358 = arith.constant 0 : index
    %523 = vector.load %arg16[%c0_356, %c0_357, %c0_358] : memref<1x1x64xf32, #tpu.memory_space<vmem>>, vector<1x1x64xf32>
    %c0_359 = arith.constant 0 : index
    %c0_360 = arith.constant 0 : index
    %c0_361 = arith.constant 0 : index
    %524 = vector.load %arg17[%c0_359, %c0_360, %c0_361] : memref<1x1x64xf32, #tpu.memory_space<vmem>>, vector<1x1x64xf32>
    %525 = arith.subf %523, %524 : vector<1x1x64xf32>
    %526 = math.absf %525 : vector<1x1x64xf32>
    %cst_362 = arith.constant dense<0.000000e+00> : vector<1x1xf32>
    %527 = vector.multi_reduction <add>, %526, %cst_362 [2] : vector<1x1x64xf32> to vector<1x1xf32>
    %528 = vector.shape_cast %527 : vector<1x1xf32> to vector<1x1x1xf32>
    %cst_363 = arith.constant dense<0.000000e+00> : vector<1x1xf32>
    %529 = vector.multi_reduction <add>, %528, %cst_363 [1] : vector<1x1x1xf32> to vector<1x1xf32>
    %530 = vector.shape_cast %529 : vector<1x1xf32> to vector<1x1x1xf32>
    %531 = arith.addf %522, %530 : vector<1x1x1xf32>
    %cst_364 = arith.constant 0.00520833349 : f32
    %532 = vector.broadcast %cst_364 : f32 to vector<1x1x1xf32>
    %533 = arith.mulf %532, %531 : vector<1x1x1xf32>
    %534 = tpu.iota {dimensions = array<i32: 2>} : vector<1x1x8xi32>
    %cst_365 = arith.constant 0.000000e+00 : f32
    %535 = vector.broadcast %cst_365 : f32 to vector<1x1x8xf32>
    %c0_i32 = arith.constant 0 : i32
    %536 = vector.broadcast %c0_i32 : i32 to vector<1x1x8xi32>
    %537 = arith.cmpi eq, %534, %536 : vector<1x1x8xi32>
    %cst_366 = arith.constant 0.000000e+00 : f32
    %538 = vector.shape_cast %227 : vector<1x1x1xf32> to vector<1x1x1xf32>
    %539 = vector.broadcast %538 : vector<1x1x1xf32> to vector<1x1x8xf32>
    %540 = vector.broadcast %cst_366 : f32 to vector<1x1x8xf32>
    %541 = arith.select %537, %539, %540 : vector<1x1x8xi1>, vector<1x1x8xf32>
    %542 = arith.addf %535, %541 : vector<1x1x8xf32>
    %c1_i32 = arith.constant 1 : i32
    %543 = vector.broadcast %c1_i32 : i32 to vector<1x1x8xi32>
    %544 = arith.cmpi eq, %534, %543 : vector<1x1x8xi32>
    %cst_367 = arith.constant 0.000000e+00 : f32
    %545 = vector.shape_cast %455 : vector<1x1x1xf32> to vector<1x1x1xf32>
    %546 = vector.broadcast %545 : vector<1x1x1xf32> to vector<1x1x8xf32>
    %547 = vector.broadcast %cst_367 : f32 to vector<1x1x8xf32>
    %548 = arith.select %544, %546, %547 : vector<1x1x8xi1>, vector<1x1x8xf32>
    %549 = arith.addf %542, %548 : vector<1x1x8xf32>
    %c2_i32 = arith.constant 2 : i32
    %550 = vector.broadcast %c2_i32 : i32 to vector<1x1x8xi32>
    %551 = arith.cmpi eq, %534, %550 : vector<1x1x8xi32>
    %cst_368 = arith.constant 0.000000e+00 : f32
    %552 = vector.shape_cast %465 : vector<1x1x1xf32> to vector<1x1x1xf32>
    %553 = vector.broadcast %552 : vector<1x1x1xf32> to vector<1x1x8xf32>
    %554 = vector.broadcast %cst_368 : f32 to vector<1x1x8xf32>
    %555 = arith.select %551, %553, %554 : vector<1x1x8xi1>, vector<1x1x8xf32>
    %556 = arith.addf %549, %555 : vector<1x1x8xf32>
    %c3_i32 = arith.constant 3 : i32
    %557 = vector.broadcast %c3_i32 : i32 to vector<1x1x8xi32>
    %558 = arith.cmpi eq, %534, %557 : vector<1x1x8xi32>
    %cst_369 = arith.constant 0.000000e+00 : f32
    %559 = vector.shape_cast %475 : vector<1x1x1xf32> to vector<1x1x1xf32>
    %560 = vector.broadcast %559 : vector<1x1x1xf32> to vector<1x1x8xf32>
    %561 = vector.broadcast %cst_369 : f32 to vector<1x1x8xf32>
    %562 = arith.select %558, %560, %561 : vector<1x1x8xi1>, vector<1x1x8xf32>
    %563 = arith.addf %556, %562 : vector<1x1x8xf32>
    %c4_i32 = arith.constant 4 : i32
    %564 = vector.broadcast %c4_i32 : i32 to vector<1x1x8xi32>
    %565 = arith.cmpi eq, %534, %564 : vector<1x1x8xi32>
    %cst_370 = arith.constant 0.000000e+00 : f32
    %566 = vector.shape_cast %485 : vector<1x1x1xf32> to vector<1x1x1xf32>
    %567 = vector.broadcast %566 : vector<1x1x1xf32> to vector<1x1x8xf32>
    %568 = vector.broadcast %cst_370 : f32 to vector<1x1x8xf32>
    %569 = arith.select %565, %567, %568 : vector<1x1x8xi1>, vector<1x1x8xf32>
    %570 = arith.addf %563, %569 : vector<1x1x8xf32>
    %c5_i32 = arith.constant 5 : i32
    %571 = vector.broadcast %c5_i32 : i32 to vector<1x1x8xi32>
    %572 = arith.cmpi eq, %534, %571 : vector<1x1x8xi32>
    %cst_371 = arith.constant 0.000000e+00 : f32
    %573 = vector.shape_cast %504 : vector<1x1x1xf32> to vector<1x1x1xf32>
    %574 = vector.broadcast %573 : vector<1x1x1xf32> to vector<1x1x8xf32>
    %575 = vector.broadcast %cst_371 : f32 to vector<1x1x8xf32>
    %576 = arith.select %572, %574, %575 : vector<1x1x8xi1>, vector<1x1x8xf32>
    %577 = arith.addf %570, %576 : vector<1x1x8xf32>
    %c6_i32 = arith.constant 6 : i32
    %578 = vector.broadcast %c6_i32 : i32 to vector<1x1x8xi32>
    %579 = arith.cmpi eq, %534, %578 : vector<1x1x8xi32>
    %cst_372 = arith.constant 0.000000e+00 : f32
    %580 = vector.shape_cast %514 : vector<1x1x1xf32> to vector<1x1x1xf32>
    %581 = vector.broadcast %580 : vector<1x1x1xf32> to vector<1x1x8xf32>
    %582 = vector.broadcast %cst_372 : f32 to vector<1x1x8xf32>
    %583 = arith.select %579, %581, %582 : vector<1x1x8xi1>, vector<1x1x8xf32>
    %584 = arith.addf %577, %583 : vector<1x1x8xf32>
    %c7_i32 = arith.constant 7 : i32
    %585 = vector.broadcast %c7_i32 : i32 to vector<1x1x8xi32>
    %586 = arith.cmpi eq, %534, %585 : vector<1x1x8xi32>
    %cst_373 = arith.constant 0.000000e+00 : f32
    %587 = vector.shape_cast %533 : vector<1x1x1xf32> to vector<1x1x1xf32>
    %588 = vector.broadcast %587 : vector<1x1x1xf32> to vector<1x1x8xf32>
    %589 = vector.broadcast %cst_373 : f32 to vector<1x1x8xf32>
    %590 = arith.select %586, %588, %589 : vector<1x1x8xi1>, vector<1x1x8xf32>
    %591 = arith.addf %584, %590 : vector<1x1x8xf32>
    %c0_374 = arith.constant 0 : index
    %c0_375 = arith.constant 0 : index
    %c0_376 = arith.constant 0 : index
    %592 = vector.load %arg18[%c0_374, %c0_375, %c0_376] : memref<1x1x8xf32, #tpu.memory_space<vmem>>, vector<1x1x8xf32>
    tpu.vector_store %arg18[%c0_374, %c0_375, %c0_376], %591 {strides = array<i32>} : memref<1x1x8xf32, #tpu.memory_space<vmem>>, vector<1x1x8xf32>,
    return
  }
  func.func @transform_0(%arg0: i32) -> i32 {
    %c0_i32 = arith.constant 0 : i32
    %c0_i32_0 = arith.constant 0 : i32
    return %c0_i32 : i32
  }
  func.func @transform_1(%arg0: i32) -> (i32, i32, i32, i32) {
    %c0_i32 = arith.constant 0 : i32
    %c0_i32_0 = arith.constant 0 : i32
    %c0_i32_1 = arith.constant 0 : i32
    %c0_i32_2 = arith.constant 0 : i32
    return %arg0, %c0_i32, %c0_i32_0, %c0_i32_1 : i32, i32, i32, i32
  }
  func.func @transform_2(%arg0: i32) -> (i32, i32, i32, i32) {
    %c0_i32 = arith.constant 0 : i32
    %c0_i32_0 = arith.constant 0 : i32
    %c0_i32_1 = arith.constant 0 : i32
    %c0_i32_2 = arith.constant 0 : i32
    return %arg0, %c0_i32, %c0_i32_0, %c0_i32_1 : i32, i32, i32, i32
  }
  func.func @transform_3(%arg0: i32) -> (i32, i32, i32) {
    %c0_i32 = arith.constant 0 : i32
    %c0_i32_0 = arith.constant 0 : i32
    %c0_i32_1 = arith.constant 0 : i32
    return %arg0, %c0_i32, %c0_i32_0 : i32, i32, i32
  }
  func.func @transform_4(%arg0: i32) -> (i32, i32, i32) {
    %c0_i32 = arith.constant 0 : i32
    %c0_i32_0 = arith.constant 0 : i32
    %c0_i32_1 = arith.constant 0 : i32
    return %arg0, %c0_i32, %c0_i32_0 : i32, i32, i32
  }
  func.func @transform_5(%arg0: i32) -> (i32, i32, i32) {
    %c0_i32 = arith.constant 0 : i32
    %c0_i32_0 = arith.constant 0 : i32
    %c0_i32_1 = arith.constant 0 : i32
    return %arg0, %c0_i32, %c0_i32_0 : i32, i32, i32
  }
  func.func @transform_6(%arg0: i32) -> (i32, i32, i32) {
    %c0_i32 = arith.constant 0 : i32
    %c0_i32_0 = arith.constant 0 : i32
    %c0_i32_1 = arith.constant 0 : i32
    return %arg0, %c0_i32, %c0_i32_0 : i32, i32, i32
  }
  func.func @transform_7(%arg0: i32) -> (i32, i32, i32) {
    %c0_i32 = arith.constant 0 : i32
    %c0_i32_0 = arith.constant 0 : i32
    %c0_i32_1 = arith.constant 0 : i32
    return %arg0, %c0_i32, %c0_i32_0 : i32, i32, i32
  }
  func.func @transform_8(%arg0: i32) -> (i32, i32, i32) {
    %c0_i32 = arith.constant 0 : i32
    %c0_i32_0 = arith.constant 0 : i32
    %c0_i32_1 = arith.constant 0 : i32
    return %arg0, %c0_i32, %c0_i32_0 : i32, i32, i32
  }
  func.func @transform_9(%arg0: i32) -> (i32, i32, i32) {
    %c0_i32 = arith.constant 0 : i32
    %c0_i32_0 = arith.constant 0 : i32
    %c0_i32_1 = arith.constant 0 : i32
    return %arg0, %c0_i32, %c0_i32_0 : i32, i32, i32
  }
  func.func @transform_10(%arg0: i32) -> (i32, i32, i32) {
    %c0_i32 = arith.constant 0 : i32
    %c0_i32_0 = arith.constant 0 : i32
    %c0_i32_1 = arith.constant 0 : i32
    return %arg0, %c0_i32, %c0_i32_0 : i32, i32, i32
  }
  func.func @transform_11(%arg0: i32) -> (i32, i32, i32) {
    %c0_i32 = arith.constant 0 : i32
    %c0_i32_0 = arith.constant 0 : i32
    %c0_i32_1 = arith.constant 0 : i32
    return %arg0, %c0_i32, %c0_i32_0 : i32, i32, i32
  }
  func.func @transform_12(%arg0: i32) -> (i32, i32, i32) {
    %c0_i32 = arith.constant 0 : i32
    %c0_i32_0 = arith.constant 0 : i32
    %c0_i32_1 = arith.constant 0 : i32
    return %arg0, %c0_i32, %c0_i32_0 : i32, i32, i32
  }
  func.func @transform_13(%arg0: i32) -> (i32, i32, i32) {
    %c0_i32 = arith.constant 0 : i32
    %c0_i32_0 = arith.constant 0 : i32
    %c0_i32_1 = arith.constant 0 : i32
    return %arg0, %c0_i32, %c0_i32_0 : i32, i32, i32
  }
  func.func @transform_14(%arg0: i32) -> (i32, i32, i32) {
    %c0_i32 = arith.constant 0 : i32
    %c0_i32_0 = arith.constant 0 : i32
    %c0_i32_1 = arith.constant 0 : i32
    return %arg0, %c0_i32, %c0_i32_0 : i32, i32, i32
  }
  func.func @transform_15(%arg0: i32) -> (i32, i32, i32) {
    %c0_i32 = arith.constant 0 : i32
    %c0_i32_0 = arith.constant 0 : i32
    %c0_i32_1 = arith.constant 0 : i32
    return %arg0, %c0_i32, %c0_i32_0 : i32, i32, i32
  }
  func.func @transform_16(%arg0: i32) -> (i32, i32, i32) {
    %c0_i32 = arith.constant 0 : i32
    %c0_i32_0 = arith.constant 0 : i32
    %c0_i32_1 = arith.constant 0 : i32
    return %arg0, %c0_i32, %c0_i32_0 : i32, i32, i32
  }
  func.func @transform_17(%arg0: i32) -> (i32, i32, i32) {
    %c0_i32 = arith.constant 0 : i32
    %c0_i32_0 = arith.constant 0 : i32
    %c0_i32_1 = arith.constant 0 : i32
    return %arg0, %c0_i32, %c0_i32_0 : i32, i32, i32
  }
}

</mosaic_0001>

<bundles_post_ra>
// kernel: tpu_custom_call.1
= control target key start
LH: loop header
LB: loop body
LE: loop exit
PB: predicated region body
PF: predicated region fallthrough
CT: control target
= control target key end

     0   :  { %s3110_s0 = inlined_call_operand.vmem [shape: f32[74], index: 0, kind: input, shape index: {}]   ;;  %s3111_s1 = inlined_call_operand.vmem [shape: f32[2,4,18,18], index: 1, kind: input, shape index: {}]   ;;  %s3112_s2 = inlined_call_operand.vmem [shape: f32[2,4,18,18], index: 2, kind: input, shape index: {}]   ;;  %s3113_s3 = inlined_call_operand.vmem [shape: f32[2,8,128], index: 3, kind: input, shape index: {}]   ;;  %s3114_s4 = inlined_call_operand.vmem [shape: f32[2,8,128], index: 4, kind: input, shape index: {}]   ;;  %s3115_s5 = inlined_call_operand.vmem [shape: f32[2,8,128], index: 5, kind: input, shape index: {}]   ;;  %s3116_s6 = inlined_call_operand.vmem [shape: f32[2,8,128], index: 6, kind: input, shape index: {}]   ;;  %s3117_s7 = inlined_call_operand.vmem [shape: f32[2,1,128], index: 7, kind: input, shape index: {}]   ;;  %s3118_s8 = inlined_call_operand.vmem [shape: f32[2,1,128], index: 8, kind: input, shape index: {}]   ;;  %s3119_s9 = inlined_call_operand.vmem [shape: f32[2,1,128], index: 9, kind: input, shape index: {}]   ;;  %s3120_s10 = inlined_call_operand.vmem [shape: f32[2,1,128], index: 10, kind: input, shape index: {}]   ;;  %s3121_s11 = inlined_call_operand.vmem [shape: f32[2,1,128], index: 11, kind: input, shape index: {}]   ;;  %s3122_s12 = inlined_call_operand.vmem [shape: f32[2,1,128], index: 12, kind: input, shape index: {}]   ;;  %s3123_s13 = inlined_call_operand.vmem [shape: f32[2,1,64], index: 13, kind: input, shape index: {}]   ;;  %s3124_s14 = inlined_call_operand.vmem [shape: f32[2,1,64], index: 14, kind: input, shape index: {}]   ;;  %s3125_s15 = inlined_call_operand.vmem [shape: f32[2,1,64], index: 15, kind: input, shape index: {}]   ;;  %s3126_s16 = inlined_call_operand.vmem [shape: f32[2,1,64], index: 16, kind: input, shape index: {}]   ;;  %s3127_s17 = inlined_call_operand.hbm [shape: f32[2,1,8], index: 17, kind: output, shape index: {}]  }
   0x1   :  { %3138 = sst [smem:[#allocation16_spill]] %s3110_s0 }
   0x2   :  { %3139 = sst [smem:[#allocation17_spill]] %s3111_s1 }
   0x3   :  { %3140 = sst [smem:[#allocation18_spill]] %s3112_s2 }
   0x4   :  { %3141 = sst [smem:[#allocation19_spill]] %s3127_s17 }
   0x5   :  { %22 = vsyncpa [#allocation4], 0 }
   0x6   :  { %23 = vsyncpa [#allocation3], 0 }
   0x7   :  { %25 = vsyncpa [#allocation3 + $0x1], 0  ;;  %s2391_s24 = smov 0   ;;  %s2393_s25 = smov 0  }
   0x8   :  { %s2395_s26 = smov 0   ;;  %s2397_s27 = smov 0  }
   0x9 LB: > { %3142 = sst [smem:[#allocation8_spill]] %s2283_s24  ;;  %s2412_s28 = sadd.s32 4294967295, %s2295_s27   ;;  %s2295_s27 = sphi %s2397_s27, %s3162_s27   ;;  %s2291_s26 = sphi %s2395_s26, %s3164_s26   ;;  %s2287_s25 = sphi %s2393_s25, %s3166_s25   ;;  %s2283_s24 = sphi %s2391_s24, %s3165_s24  }
   0xa   : > { %3143 = sst [smem:[#allocation9_spill]] %s2291_s26  ;;  %s2037_s29 = sadd.s32 4294967294, %s2295_s27  }
   0xb   : > { %3144 = sst [smem:[#allocation10_spill]] %s2295_s27  ;;  %s2416_s0 = sadd.s32 1, %s2295_s27  }
   0xc   : > { %3145 = sst [smem:[#allocation11_spill]] %s2412_s28  ;;  %s475_s30 = sadd.s32 1, %s2291_s26 }
   0xd   : > { %3146 = sst [smem:[#allocation12_spill]] %s2416_s0  ;;  %s472_s18 = ssub.s32 %s2295_s27, %s2416_s0 }
   0xe   : > { %p485_p0 = scmp.ne.s32.totalorder %s2291_s26, %s2287_s25  ;;  %p473_p1 = scmp.eq.s32.totalorder %s472_s18, 0 }
   0xf   : > { %p486_p2 = scmp.eq.s32.totalorder %s2412_s28, 1  ;;  %p491_p3 = scmp.ne.s32.totalorder %s2287_s25, %s2283_s24 }
  0x10   : > { %p492_p4 = scmp.eq.s32.totalorder %s2037_s29, 1  ;;  %p2038_p7 = scmp.ge.s32.totalorder %s2295_s27, 1 }
  0x11   : > { %s2427_s19 = scalar_select %p473_p1, %s2291_s26, %s475_s30  }
  0x12   : > { %p2429_p5 = por %p486_p2, %p485_p0  ;;  %p2433_p6 = por %p492_p4, %p491_p3 }
  0x13   : > { %3147 = sst [smem:[#allocation13_spill]] %s2427_s19  ;;  %p499_p8 = scmp.lt.s32.totalorder %s2295_s27, 3 }
  0x14   : > { %s3148_s1 = scalar_select %p2429_p5, 1, 0 }
  0x15   : > { %s3150_s20 = scalar_select %p2433_p6, 1, 0 }
  0x16   : > { %3149 = sst [smem:[#allocation14_spill]] %s3148_s1  ;;  %p2176_p9 = scmp.eq.s32.totalorder %s2412_s28, 0 }
  0x17   : > { %3151 = sst [smem:[#allocation15_spill]] %s3150_s20  ;;  %p2440_p10 = pnand %p2038_p7, %p499_p8 }
  0x18   : > { %s3153_s29 = sld [smem:[#allocation16_spill]] }
  0x19   : > { %p2168_p11 = pneg %p2440_p10 }
  0x1b   : > { %p2169_p12 = pnand %p2176_p9, %p2168_p11 }
  0x1d   : > { %p2216_p0 = pneg %p2169_p12 }
  0x1e   : > { %s512_s30 = sshll.u32 %s3153_s29, 4  ;;  %s513_s30 = int_to_ptr.vmem [resolvable:$true] %s512_s30 }
  0x1f   : > { %s2214_s18 = scalar_lea.vmem %s513_s30, 16  ;;  %p2222_p3 = scmp.lt.s32.totalorder %s513_s30, %s513_s30 }
  0x20   : > { %p2215_p13 = scmp.ne.s32.totalorder %s513_s30, %s2214_s18  ;;  %p2223_p4 = scmp.lt.s32.totalorder %s2214_s18, %s2214_s18 }
  0x22   : > { %p2217_p1 = pnand %p2216_p0, %p2215_p13  ;;  %p2224_p7 = por %p2223_p4, %p2222_p3 }
  0x24   : > { %p2218_p2 = pneg %p2217_p1 }
  0x26   : > { %p2225_p8 = pnand %p2224_p7, %p2218_p2 }
  0x28   : > { %2228 = shalt.err (!%p2225_p8)
}
  0x29   : > { %s2297_s19 = smov [#allocation2]   ;;  %629 = sbr.rel (%p2440_p10) target bundleno = 565 (0x235), region = 88 }
  0x2a   : > { %2171 = dma.vmem_to_smem (!%p2169_p12), %s513_s30, 16, %s2297_s19, [#allocation4]  }
  0x30   : > { %2274 = dma.done.wait (%p2176_p9), [#allocation4], 16  }
  0x31   : > { %2276 = vsyncadd (%p2176_p9), [#allocation4], 4294967280 }
  0x32   : > { %635 = sfence }
  0x33   : > { %p732_p11 = scmp.lt.s32.totalorder %s2412_s28, 1  ;;  %s2050_s22 = sld [smem:[#allocation2 + $0x2]]  ;;  %vm1229_vm0 = vcmask 130048   ;;  %vm1729_vm1 = vcmask 1040384   ;;  %vm1746_vm2 = vcmask 516096   ;;  %vm1805_vm11 = vcmask 57344  }
  0x34   : > { %s2049_s23 = sld [smem:[#allocation2 + $0x1]]  ;;  %s2052_s18 = sld [smem:[#allocation2 + $0x4]] }
  0x35   : > { %s2459_s29 = scalar_select %p732_p11, %s2412_s28, 1 }
  0x36   : > { %s3154_s26 = sld [smem:[#allocation17_spill]]  ;;  %s2298_s30 = smov 126  }
  0x37   : > { %s2161_s19 = smul.u32 96, %s2459_s29  ;;  %s2053_s20 = sld [smem:[#allocation2 + $0x5]] }
  0x38   : > { %s3155_s2 = sld [smem:[#allocation18_spill]]  ;;  %s2107_s24 = sld [smem:[#allocation2 + $0x28]] }
  0x39   : > { %v811_v0 = vstv %s2050_s22  ;;  %s2104_s22 = sld [smem:[#allocation2 + $0x25]]  ;;  %s2060_s21 = sld [smem:[#allocation2 + $0xa]] }
  0x3a   : > { %v797_v3 = vstv %s2049_s23  ;;  %v833_v9 = vstv %s2052_s18  ;;  %s2105_s23 = sld [smem:[#allocation2 + $0x26]]  ;;  %s2055_s18 = sld [smem:[#allocation2 + $0x7]] }
  0x3b   : > { %s763_s28 = scalar_lea.vmem %s3118_s8, %s2459_s29  ;;  %s766_s17 = scalar_lea.vmem %s3119_s9, %s2459_s29 }
  0x3c   : > { %s2465_s0 = scalar_lea.vmem %s3154_s26, %s2161_s19  ;;  %s2299_s26 = smov 127  }
  0x3d   : > { %v2468_v1 = vld [vmem:[%s2465_s0] sm:$0xff]  ;;  %v2471_v2 = vld [vmem:[%s2465_s0 + $0x8] sm:$0xff]  ;;  %v847_v13 = vstv %s2053_s20  ;;  %s2108_s20 = sld [smem:[#allocation2 + $0x29]]  ;;  %v2558_v50 = vld [vmem:[%s2465_s0 + $0x18] sm:$0xff]  ;;  %s730_s1 = sand.u32 1, %s2287_s25  }
  0x3e   : > { %v812_v4 = vmul.f32 %v811_v0, %v2468_v1  ;;  %v798_v5 = vmul.f32 %v797_v3, %v2468_v1  ;;  %v813_v6 = vmul.f32 %v811_v0, %v2471_v2  ;;  %v799_v7 = vmul.f32 %v797_v3, %v2471_v2  ;;  %v2480_v8 = vld [vmem:[%s2465_s0 + $0x9] sm:$0xff]  ;;  %v2483_v10 = vld [vmem:[%s2465_s0 + $0x1] sm:$0xff]  ;;  %s2492_s27 = scalar_lea.vmem %s3155_s2, %s2161_s19  ;;  %s2110_s19 = sld [smem:[#allocation2 + $0x2b]] }
  0x3f   : > { %v835_v11 = vmul.f32 %v833_v9, %v2480_v8  ;;  %v834_v12 = vmul.f32 %v833_v9, %v2483_v10  ;;  %v849_v14 = vmul.f32 %v847_v13, %v2480_v8  ;;  %v848_v15 = vmul.f32 %v847_v13, %v2483_v10  ;;  %v2499_v16 = vld [vmem:[%s2492_s27 + $0x8] sm:$0xff]  ;;  %v2502_v18 = vld [vmem:[%s2492_s27] sm:$0xff]  ;;  %v2568_v55 = vld [vmem:[%s2492_s27 + $0x18] sm:$0xff]  ;;  %s760_s2 = scalar_lea.vmem %s3117_s7, %s2459_s29 }
  0x40   : > { %816 = vrot.lane.b32.xlu1 %v812_v4, %s2298_s30  ;;  %802 = vrot.lane.b32.xlu0 %v798_v5, %s2299_s26  ;;  %v1253_v17 = vstv %s2104_s22  ;;  %v1267_v21 = vstv %s2105_s23  ;;  %s2056_s22 = sld [smem:[#allocation2 + $0x8]]  ;;  %s2111_s23 = sld [smem:[#allocation2 + $0x2c]] }
  0x41   : > { %v1255_v19 = vmul.f32 %v1253_v17, %v2499_v16  ;;  %v1254_v20 = vmul.f32 %v1253_v17, %v2502_v18  ;;  %v1269_v22 = vmul.f32 %v1267_v21, %v2499_v16  ;;  %v1268_v23 = vmul.f32 %v1267_v21, %v2502_v18  ;;  %v2513_v24 = vld [vmem:[%s2492_s27 + $0x9] sm:$0xff]  ;;  %v2516_v26 = vld [vmem:[%s2492_s27 + $0x1] sm:$0xff]  ;;  %v2586_v4 = vld [vmem:[%s2465_s0 + $0x19] sm:$0xff] }
  0x42   : > { %v1289_v25 = vstv %s2107_s24  ;;  %v2527_v32 = vld [vmem:[%s2465_s0 + $0xa] sm:$0xff]  ;;  %v869_v33 = vstv %s2055_s18  ;;  %v2530_v34 = vld [vmem:[%s2465_s0 + $0x2] sm:$0xff]  ;;  %s2115_s24 = sld [smem:[#allocation2 + $0x2e]]  ;;  %s2116_s18 = sld [smem:[#allocation2 + $0x2f]] }
  0x43   : > { %v1291_v27 = vmul.f32 %v1289_v25, %v2513_v24  ;;  %v1290_v28 = vmul.f32 %v1289_v25, %v2516_v26  ;;  %v1303_v29 = vstv %s2108_s20  ;;  %v871_v35 = vmul.f32 %v869_v33, %v2527_v32  ;;  %v2537_v37 = vld [vmem:[%s2492_s27 + $0xa] sm:$0xff]  ;;  %v2540_v39 = vld [vmem:[%s2492_s27 + $0x2] sm:$0xff]  ;;  %s2061_s20 = sld [smem:[#allocation2 + $0xb]]  ;;  %v2614_v25 = vld [vmem:[%s2465_s0 + $0x1a] sm:$0xff] }
  0x44   : > { %818 = vrot.lane.b32.xlu1 %v813_v6, %s2298_s30  ;;  %804 = vrot.lane.b32.xlu0 %v799_v7, %s2299_s26  ;;  %v1305_v30 = vmul.f32 %v1303_v29, %v2513_v24  ;;  %v1304_v31 = vmul.f32 %v1303_v29, %v2516_v26  ;;  %v870_v36 = vmul.f32 %v869_v33, %v2530_v34  ;;  %v1325_v38 = vstv %s2110_s19  ;;  %v2555_v48 = vld [vmem:[%s2465_s0 + $0x20] sm:$0xff]  ;;  %s2065_s19 = sld [smem:[#allocation2 + $0xd]] }
  0x45   : > { %v1327_v40 = vmul.f32 %v1325_v38, %v2537_v37  ;;  %v1326_v41 = vmul.f32 %v1325_v38, %v2540_v39  ;;  %v906_v49 = vstv %s2060_s21  ;;  %v2565_v53 = vld [vmem:[%s2492_s27 + $0x20] sm:$0xff]  ;;  %s2121_s21 = sld [smem:[#allocation2 + $0x32]] }
  0x46   : > { %v883_v42 = vstv %s2056_s22  ;;  %v1339_v45 = vstv %s2111_s23  ;;  %v908_v51 = vmul.f32 %v2555_v48, %v906_v49  ;;  %v907_v52 = vmul.f32 %v2558_v50, %v906_v49  ;;  %s2120_s22 = sld [smem:[#allocation2 + $0x31]]  ;;  %v2583_v0 = vld [vmem:[%s2465_s0 + $0x21] sm:$0xff]  ;;  %s2066_s23 = sld [smem:[#allocation2 + $0xe]] }
  0x47   : > { %v885_v43 = vmul.f32 %v883_v42, %v2527_v32  ;;  %v884_v44 = vmul.f32 %v883_v42, %v2530_v34  ;;  %v1341_v46 = vmul.f32 %v1339_v45, %v2537_v37  ;;  %v1340_v47 = vmul.f32 %v1339_v45, %v2540_v39  ;;  %v2593_v7 = vld [vmem:[%s2492_s27 + $0x21] sm:$0xff] }
  0x48   : > { %840 = vrot.lane.b32.xlu1 %v835_v11, %s2299_s26  ;;  %838 = vrot.lane.b32.xlu0 %v834_v12, %s2299_s26  ;;  %v1362_v54 = vstv %s2115_s24  ;;  %v1376_v61 = vstv %s2116_s18  ;;  %s2070_s24 = sld [smem:[#allocation2 + $0x10]]  ;;  %s2071_s18 = sld [smem:[#allocation2 + $0x11]] }
  0x49   : > { %v1364_v56 = vmul.f32 %v2565_v53, %v1362_v54  ;;  %v1363_v57 = vmul.f32 %v2568_v55, %v1362_v54  ;;  %v920_v58 = vstv %s2061_s20  ;;  %v1378_v62 = vmul.f32 %v2565_v53, %v1376_v61  ;;  %v2596_v11 = vld [vmem:[%s2492_s27 + $0x19] sm:$0xff]  ;;  %s2125_s20 = sld [smem:[#allocation2 + $0x34]]  ;;  %v2621_v29 = vld [vmem:[%s2492_s27 + $0x22] sm:$0xff]  ;;  %v2652_v54 = vld [vmem:[%s2492_s27 + $0x30] sm:$0xff] }
  0x4a   : > { %v922_v59 = vmul.f32 %v2555_v48, %v920_v58  ;;  %v921_v60 = vmul.f32 %v2558_v50, %v920_v58  ;;  %v1377_v63 = vmul.f32 %v2568_v55, %v1376_v61  ;;  %v942_v3 = vstv %s2065_s19  ;;  %s2126_s19 = sld [smem:[#allocation2 + $0x35]] }
  0x4b   : > { %v944_v5 = vmul.f32 %v2583_v0, %v942_v3  ;;  %v943_v6 = vmul.f32 %v2586_v4, %v942_v3  ;;  %v2671_v3 = vld [vmem:[%s2465_s0 + $0x39] sm:$0xff] }
  0x4c   : > { %854 = vrot.lane.b32.xlu1 %v849_v14, %s2298_s30  ;;  %852 = vrot.lane.b32.xlu0 %v848_v15, %s2298_s30  ;;  %v1398_v9 = vstv %s2120_s22  ;;  %v956_v14 = vstv %s2066_s23  ;;  %s2075_s22 = sld [smem:[#allocation2 + $0x13]]  ;;  %s2130_s23 = sld [smem:[#allocation2 + $0x37]] }
  0x4d   : > { %v1400_v12 = vmul.f32 %v2593_v7, %v1398_v9  ;;  %v1399_v13 = vmul.f32 %v2596_v11, %v1398_v9  ;;  %v958_v15 = vmul.f32 %v2583_v0, %v956_v14  ;;  %v957_v17 = vmul.f32 %v2586_v4, %v956_v14  ;;  %v2682_v14 = vld [vmem:[%s2492_s27 + $0x39] sm:$0xff] }
  0x50   : > { %1260 = vrot.lane.b32.xlu1 %v1255_v19, %s2299_s26  ;;  %1258 = vrot.lane.b32.xlu0 %v1254_v20, %s2299_s26  ;;  %v1412_v19 = vstv %s2121_s21  ;;  %s2076_s21 = sld [smem:[#allocation2 + $0x14]] }
  0x51   : > { %v1414_v20 = vmul.f32 %v2593_v7, %v1412_v19  ;;  %v1413_v21 = vmul.f32 %v2596_v11, %v1412_v19 }
  0x52   : > { %v1015_v45 = vstv %s2075_s22  ;;  %s2668_s22 = sld [smem:[#allocation2 + $0x3]] }
  0x54   : > { %1274 = vrot.lane.b32.xlu1 %v1269_v22, %s2298_s30  ;;  %1272 = vrot.lane.b32.xlu0 %v1268_v23, %s2298_s30  ;;  %v2611_v22 = vld [vmem:[%s2465_s0 + $0x22] sm:$0xff]  ;;  %v978_v23 = vstv %s2070_s24  ;;  %s2131_s24 = sld [smem:[#allocation2 + $0x38]] }
  0x56   : > { %v1029_v58 = vstv %s2076_s21  ;;  %s2687_s21 = sld [smem:[#allocation2 + $0x3b]] }
  0x58   : > { %1296 = vrot.lane.b32.xlu1 %v1291_v27, %s2299_s26  ;;  %1294 = vrot.lane.b32.xlu0 %v1290_v28, %s2299_s26  ;;  %v980_v27 = vmul.f32 %v2611_v22, %v978_v23  ;;  %v979_v28 = vmul.f32 %v2614_v25, %v978_v23  ;;  %v827_v23 = vstv %s2668_s22  ;;  %s2722_s22 = sld [smem:[#allocation2 + $0x1a]] }
  0x5a   : > { %v1485_v61 = vstv %s2131_s24  ;;  %s2695_s24 = sld [smem:[#allocation2 + $0x19]] }
  0x5c   : > { %1310 = vrot.lane.b32.xlu1 %v1305_v30, %s2298_s30  ;;  %1308 = vrot.lane.b32.xlu0 %v1304_v31, %s2298_s30  ;;  %v1434_v30 = vstv %s2125_s20  ;;  %v2624_v31 = vld [vmem:[%s2492_s27 + $0x1a] sm:$0xff]  ;;  %s2080_s20 = sld [smem:[#allocation2 + $0x16]] }
  0x5d   : > { %v1436_v33 = vmul.f32 %v2621_v29, %v1434_v30 }
  0x60   : > { %876 = vrot.lane.b32.xlu1 %v871_v35, %s2299_s26  ;;  %874 = vrot.lane.b32.xlu0 %v870_v36, %s2299_s26  ;;  %v1435_v35 = vmul.f32 %v2624_v31, %v1434_v30  ;;  %v992_v36 = vstv %s2071_s18  ;;  %s2662_s18 = sld [smem:[#allocation2]] }
  0x61   : > { %v994_v38 = vmul.f32 %v2611_v22, %v992_v36 }
  0x64   : > { %1332 = vrot.lane.b32.xlu1 %v1327_v40, %s2299_s26  ;;  %1330 = vrot.lane.b32.xlu0 %v1326_v41, %s2299_s26  ;;  %v993_v40 = vmul.f32 %v2614_v25, %v992_v36  ;;  %v1448_v41 = vstv %s2126_s19  ;;  %s2135_s19 = sld [smem:[#allocation2 + $0x3a]] }
  0x65   : > { %v1450_v42 = vmul.f32 %v2621_v29, %v1448_v41 }
  0x68   : > { %890 = vrot.lane.b32.xlu1 %v885_v43, %s2298_s30  ;;  %888 = vrot.lane.b32.xlu0 %v884_v44, %s2298_s30  ;;  %v1449_v43 = vmul.f32 %v2624_v31, %v1448_v41  ;;  %v2639_v44 = vld [vmem:[%s2465_s0 + $0x38] sm:$0xff]  ;;  %v1521_v41 = vstv %s2687_s21  ;;  %s2738_s21 = sld [smem:[#allocation2 + $0x3e]] }
  0x6c   : > { %1346 = vrot.lane.b32.xlu1 %v1341_v46, %s2298_s30  ;;  %1344 = vrot.lane.b32.xlu0 %v1340_v47, %s2298_s30  ;;  %v2642_v46 = vld [vmem:[%s2465_s0 + $0x30] sm:$0xff]  ;;  %v1017_v47 = vmul.f32 %v2639_v44, %v1015_v45 }
  0x6d   : > { %v1016_v49 = vmul.f32 %v2642_v46, %v1015_v45 }
  0x70   : > { %913 = vrot.lane.b32.xlu1 %v908_v51, %s2299_s26  ;;  %911 = vrot.lane.b32.xlu0 %v907_v52, %s2299_s26  ;;  %v2649_v51 = vld [vmem:[%s2492_s27 + $0x38] sm:$0xff]  ;;  %v1471_v52 = vstv %s2130_s23  ;;  %s2081_s23 = sld [smem:[#allocation2 + $0x17]] }
  0x74   : > { %1369 = vrot.lane.b32.xlu1 %v1364_v56, %s2299_s26  ;;  %1367 = vrot.lane.b32.xlu0 %v1363_v57, %s2299_s26  ;;  %v1473_v56 = vmul.f32 %v2649_v51, %v1471_v52  ;;  %v1472_v57 = vmul.f32 %v2652_v54, %v1471_v52 }
  0x78   : > { %927 = vrot.lane.b32.xlu1 %v922_v59, %s2298_s30  ;;  %925 = vrot.lane.b32.xlu0 %v921_v60, %s2298_s30  ;;  %v1031_v59 = vmul.f32 %v2639_v44, %v1029_v58  ;;  %v1030_v60 = vmul.f32 %v2642_v46, %v1029_v58  ;;  %v2720_v58 = vld [vmem:[%s2465_s0 + $0x32] sm:$0xff] }
  0x7c   : > { %1383 = vrot.lane.b32.xlu1 %v1378_v62, %s2298_s30  ;;  %1381 = vrot.lane.b32.xlu0 %v1377_v63, %s2298_s30  ;;  %v1487_v62 = vmul.f32 %v2649_v51, %v1485_v61  ;;  %v1486_v63 = vmul.f32 %v2652_v54, %v1485_v61 }
  0x80   : > { %949 = vrot.lane.b32.xlu1 %v944_v5, %s2299_s26  ;;  %947 = vrot.lane.b32.xlu0 %v943_v6, %s2299_s26  ;;  %v1051_v5 = vstv %s2080_s20  ;;  %v2674_v6 = vld [vmem:[%s2465_s0 + $0x31] sm:$0xff]  ;;  %s2697_s20 = sld [smem:[#allocation2 + $0x6]] }
  0x81   : > { %v1053_v9 = vmul.f32 %v2671_v3, %v1051_v5 }
  0x84   : > { %1405 = vrot.lane.b32.xlu1 %v1400_v12, %s2299_s26  ;;  %1403 = vrot.lane.b32.xlu0 %v1399_v13, %s2299_s26  ;;  %v1052_v12 = vmul.f32 %v2674_v6, %v1051_v5  ;;  %v791_v13 = vstv %s2662_s18  ;;  %s2705_s18 = sld [smem:[#allocation2 + $0x3d]] }
  0x85   : > { %v792_v19 = vmul.f32 %v791_v13, %v2468_v1  ;;  %v793_v1 = vmul.f32 %v791_v13, %v2471_v2  ;;  %v2733_v13 = vld [vmem:[%s2492_s27 + $0x3a] sm:$0xff] }
  0x88   : > { %963 = vrot.lane.b32.xlu1 %v958_v15, %s2298_s30  ;;  %961 = vrot.lane.b32.xlu0 %v957_v17, %s2298_s30  ;;  %v1507_v15 = vstv %s2135_s19  ;;  %v2685_v17 = vld [vmem:[%s2492_s27 + $0x31] sm:$0xff]  ;;  %s2708_s19 = sld [smem:[#allocation2 + $0x24]] }
  0x8a   : > { %v1543_v5 = vstv %s2705_s18  ;;  %s2762_s18 = sld [smem:[#allocation2 + $0x40]] }
  0x8c   : > { %1419 = vrot.lane.b32.xlu1 %v1414_v20, %s2298_s30  ;;  %1417 = vrot.lane.b32.xlu0 %v1413_v21, %s2298_s30  ;;  %v1509_v20 = vmul.f32 %v2682_v14, %v1507_v15  ;;  %v1508_v21 = vmul.f32 %v2685_v17, %v1507_v15  ;;  %v2736_v15 = vld [vmem:[%s2492_s27 + $0x32] sm:$0xff] }
  0x90   : > { %985 = vrot.lane.b32.xlu1 %v980_v27, %s2299_s26  ;;  %983 = vrot.lane.b32.xlu0 %v979_v28, %s2299_s26  ;;  %v1065_v27 = vstv %s2081_s23  ;;  %s2724_s23 = sld [smem:[#allocation2 + $0x27]] }
  0x91   : > { %v1067_v36 = vmul.f32 %v2671_v3, %v1065_v27 }
  0x94   : > { %1441 = vrot.lane.b32.xlu1 %v1436_v33, %s2299_s26  ;;  %1439 = vrot.lane.b32.xlu0 %v1435_v35, %s2299_s26  ;;  %v828_v35 = vmul.f32 %v827_v23, %v2483_v10  ;;  %v829_v10 = vmul.f32 %v827_v23, %v2480_v8 }
  0x98   : > { %999 = vrot.lane.b32.xlu1 %v994_v38, %s2298_s30  ;;  %997 = vrot.lane.b32.xlu0 %v993_v40, %s2298_s30  ;;  %v1066_v38 = vmul.f32 %v2674_v6, %v1065_v27  ;;  %v1247_v27 = vstv %s2708_s19  ;;  %s2775_s19 = sld [smem:[#allocation2 + $0x1d]] }
  0x9c   : > { %1455 = vrot.lane.b32.xlu1 %v1450_v42, %s2298_s30  ;;  %1453 = vrot.lane.b32.xlu0 %v1449_v43, %s2298_s30 }
  0xa0   : > { %1022 = vrot.lane.b32.xlu1 %v1017_v47, %s2299_s26  ;;  %1020 = vrot.lane.b32.xlu0 %v1016_v49, %s2299_s26  ;;  %v1523_v47 = vmul.f32 %v2682_v14, %v1521_v41  ;;  %v1522_v49 = vmul.f32 %v2685_v17, %v1521_v41 }
  0xa4   : > { %1478 = vrot.lane.b32.xlu1 %v1473_v56, %s2299_s26  ;;  %1476 = vrot.lane.b32.xlu0 %v1472_v57, %s2299_s26  ;;  %v2716_v56 = vld [vmem:[%s2465_s0 + $0x3a] sm:$0xff]  ;;  %v1087_v57 = vstv %s2695_s24  ;;  %s2750_s24 = sld [smem:[#allocation2 + $0x1c]] }
  0xa8   : > { %1036 = vrot.lane.b32.xlu1 %v1031_v59, %s2298_s30  ;;  %1034 = vrot.lane.b32.xlu0 %v1030_v60, %s2298_s30  ;;  %v863_v60 = vstv %s2697_s20  ;;  %s2753_s20 = sld [smem:[#allocation2 + $0x2a]] }
  0xac   : > { %1492 = vrot.lane.b32.xlu1 %v1487_v62, %s2298_s30  ;;  %1490 = vrot.lane.b32.xlu0 %v1486_v63, %s2298_s30  ;;  %v1089_v62 = vmul.f32 %v2716_v56, %v1087_v57  ;;  %v1088_v63 = vmul.f32 %v2720_v58, %v1087_v57 }
  0xb0   : > { %1058 = vrot.lane.b32.xlu1 %v1053_v9, %s2299_s26  ;;  %1056 = vrot.lane.b32.xlu0 %v1052_v12, %s2299_s26 }
  0xb2   : > { %v817_v28 = vpop.permute.xlu1 %816  ;;  %v803_v30 = vpop.permute.xlu0 %802 }
  0xb3   : > { %v808_v33 = vadd.f32 %v803_v30, %v792_v19  ;;  %v865_v19 = vmul.f32 %v863_v60, %v2527_v32  ;;  %v1248_v32 = vmul.f32 %v1247_v27, %v2502_v18 }
  0xb4   : > { %1514 = vrot.lane.b32.xlu1 %v1509_v20, %s2299_s26  ;;  %1512 = vrot.lane.b32.xlu0 %v1508_v21, %s2299_s26  ;;  %v864_v20 = vmul.f32 %v863_v60, %v2530_v34 }
  0xb5   : > { %v822_v40 = vadd.f32 %v817_v28, %v808_v33  ;;  %v1249_v33 = vmul.f32 %v1247_v27, %v2499_v16  ;;  %v2783_v27 = vld [vmem:[%s2492_s27 + $0x50] sm:$0xff] }
  0xb6   : > { %v819_v42 = vpop.permute.xlu1 %818  ;;  %v805_v43 = vpop.permute.xlu0 %804 }
  0xb7   : > { %v809_v2 = vadd.f32 %v805_v43, %v793_v1  ;;  %v830_v45 = vadd.f32 %v828_v35, %v822_v40  ;;  %v1545_v1 = vmul.f32 %v2733_v13, %v1543_v5  ;;  %v1544_v35 = vmul.f32 %v2736_v15, %v1543_v5 }
  0xb8   : > { %1072 = vrot.lane.b32.xlu1 %v1067_v36, %s2298_s30  ;;  %1070 = vrot.lane.b32.xlu0 %v1066_v38, %s2298_s30  ;;  %v1101_v36 = vstv %s2722_s22  ;;  %s2791_s22 = sld [smem:[#allocation2 + $0x41]] }
  0xb9   : > { %v823_v52 = vadd.f32 %v819_v42, %v809_v2  ;;  %v1283_v42 = vstv %s2724_s23  ;;  %v1103_v43 = vmul.f32 %v2716_v56, %v1101_v36  ;;  %v1102_v18 = vmul.f32 %v2720_v58, %v1101_v36  ;;  %s2793_s23 = sld [smem:[#allocation2 + $0x9]] }
  0xba   : > { %v841_v8 = vpop.permute.xlu1 %840  ;;  %v839_v59 = vpop.permute.xlu0 %838 }
  0xbb   : > { %v831_v61 = vadd.f32 %v829_v10, %v823_v52  ;;  %v844_v12 = vadd.f32 %v839_v59, %v830_v45  ;;  %v1285_v10 = vmul.f32 %v1283_v42, %v2513_v24  ;;  %v1284_v45 = vmul.f32 %v1283_v42, %v2516_v26 }
  0xbc   : > { %1528 = vrot.lane.b32.xlu1 %v1523_v47, %s2298_s30  ;;  %1526 = vrot.lane.b32.xlu0 %v1522_v49, %s2298_s30  ;;  %v1557_v47 = vstv %s2738_s21  ;;  %s2800_s21 = sld [smem:[#allocation2 + $0x1f]] }
  0xbd   : > { %v845_v9 = vadd.f32 %v841_v8, %v831_v61  ;;  %v1559_v59 = vmul.f32 %v2733_v13, %v1557_v47  ;;  %v1558_v60 = vmul.f32 %v2736_v15, %v1557_v47  ;;  %v2769_v61 = vld [vmem:[%s2465_s0 + $0x50] sm:$0xff] }
  0xbe   : > { %v855_v21 = vpop.permute.xlu1 %854  ;;  %v853_v23 = vpop.permute.xlu0 %852 }
  0xbf   : > { %v859_v28 = vadd.f32 %v855_v21, %v845_v9  ;;  %v858_v30 = vadd.f32 %v853_v23, %v844_v12  ;;  %v1319_v12 = vstv %s2753_s20  ;;  %s2808_s20 = sld [smem:[#allocation2 + $0x43]] }
  0xc0   : > { %1094 = vrot.lane.b32.xlu1 %v1089_v62, %s2299_s26  ;;  %1092 = vrot.lane.b32.xlu0 %v1088_v63, %s2299_s26  ;;  %v1124_v62 = vstv %s2750_s24  ;;  %v2773_v63 = vld [vmem:[%s2465_s0 + $0x48] sm:$0xff]  ;;  %s2802_s24 = sld [smem:[#allocation2 + $0x2d]] }
  0xc1   : > { %v867_v34 = vadd.f32 %v865_v19, %v859_v28  ;;  %v866_v38 = vadd.f32 %v864_v20, %v858_v30  ;;  %v1126_v21 = vmul.f32 %v2769_v61, %v1124_v62  ;;  %v1125_v23 = vmul.f32 %v2773_v63, %v1124_v62  ;;  %v2787_v30 = vld [vmem:[%s2492_s27 + $0x48] sm:$0xff] }
  0xc2   : > { %v1261_v40 = vpop.permute.xlu1 %1260  ;;  %v1259_v41 = vpop.permute.xlu0 %1258  ;;  %v1580_v28 = vstv %s2762_s18  ;;  %v2821_v62 = vld [vmem:[%s2465_s0 + $0x49] sm:$0xff]  ;;  %s2825_s18 = sld [smem:[#allocation2 + $0x20]] }
  0xc3   : > { %v1265_v16 = vadd.f32 %v1261_v40, %v1249_v33  ;;  %v1264_v2 = vadd.f32 %v1259_v41, %v1248_v32  ;;  %v1321_v33 = vmul.f32 %v1319_v12, %v2537_v37  ;;  %v1582_v41 = vmul.f32 %v2783_v27, %v1580_v28 }
  0xc4   : > { %1550 = vrot.lane.b32.xlu1 %v1545_v1, %s2299_s26  ;;  %1548 = vrot.lane.b32.xlu0 %v1544_v35, %s2299_s26  ;;  %v1320_v1 = vmul.f32 %v1319_v12, %v2540_v39  ;;  %v1581_v42 = vmul.f32 %v2787_v30, %v1580_v28  ;;  %v1138_v39 = vstv %s2775_s19  ;;  %s2841_s19 = sld [smem:[#allocation2 + $0x44]] }
  0xc5   : > { %v1139_v47 = vmul.f32 %v2773_v63, %v1138_v39 }
  0xc6   : > { %v1275_v49 = vpop.permute.xlu1 %1274  ;;  %v1273_v52 = vpop.permute.xlu0 %1272 }
  0xc7   : > { %v1279_v57 = vadd.f32 %v1275_v49, %v1265_v16  ;;  %v1278_v8 = vadd.f32 %v1273_v52, %v1264_v2  ;;  %v1594_v49 = vstv %s2791_s22  ;;  %s2843_s22 = sld [smem:[#allocation2 + $0xc]] }
  0xc8   : > { %1108 = vrot.lane.b32.xlu1 %v1103_v43, %s2298_s30  ;;  %1106 = vrot.lane.b32.xlu0 %v1102_v18, %s2298_s30 }
  0xc9   : > { %v1287_v24 = vadd.f32 %v1285_v10, %v1279_v57  ;;  %v1286_v26 = vadd.f32 %v1284_v45, %v1278_v8  ;;  %v1140_v45 = vmul.f32 %v2769_v61, %v1138_v39  ;;  %v900_v8 = vstv %s2793_s23  ;;  %s2850_s23 = sld [smem:[#allocation2 + $0x22]] }
  0xca   : > { %v1297_v5 = vpop.permute.xlu1 %1296  ;;  %v1295_v9 = vpop.permute.xlu0 %1294 }
  0xcb   : > { %v1301_v19 = vadd.f32 %v1297_v5, %v1287_v24  ;;  %v1300_v20 = vadd.f32 %v1295_v9, %v1286_v26  ;;  %v2817_v24 = vld [vmem:[%s2465_s0 + $0x51] sm:$0xff]  ;;  %v1160_v26 = vstv %s2800_s21  ;;  %v902_v5 = vmul.f32 %v2555_v48, %v900_v8  ;;  %s2852_s21 = sld [smem:[#allocation2 + $0x30]] }
  0xcc   : > { %1564 = vrot.lane.b32.xlu1 %v1559_v59, %s2298_s30  ;;  %1562 = vrot.lane.b32.xlu0 %v1558_v60, %s2298_s30  ;;  %v1596_v59 = vmul.f32 %v2783_v27, %v1594_v49  ;;  %v1595_v60 = vmul.f32 %v2787_v30, %v1594_v49  ;;  %v901_v9 = vmul.f32 %v2558_v50, %v900_v8  ;;  %v2837_v50 = vld [vmem:[%s2492_s27 + $0x49] sm:$0xff] }
  0xcd   : > { %v1162_v28 = vmul.f32 %v2817_v24, %v1160_v26 }
  0xce   : > { %v1311_v35 = vpop.permute.xlu1 %1310  ;;  %v1309_v32 = vpop.permute.xlu0 %1308 }
  0xcf   : > { %v1315_v36 = vadd.f32 %v1311_v35, %v1301_v19  ;;  %v1314_v40 = vadd.f32 %v1309_v32, %v1300_v20  ;;  %v1356_v20 = vstv %s2802_s24  ;;  %v2834_v32 = vld [vmem:[%s2492_s27 + $0x51] sm:$0xff]  ;;  %s2859_s24 = sld [smem:[#allocation2 + $0x46]] }
  0xd0   : > { %1131 = vrot.lane.b32.xlu1 %v1126_v21, %s2299_s26  ;;  %1129 = vrot.lane.b32.xlu0 %v1125_v23, %s2299_s26 }
  0xd1   : > { %v1323_v37 = vadd.f32 %v1321_v33, %v1315_v36  ;;  %v1322_v16 = vadd.f32 %v1320_v1, %v1314_v40  ;;  %v1161_v33 = vmul.f32 %v2821_v62, %v1160_v26  ;;  %v1616_v1 = vstv %s2808_s20  ;;  %s2876_s20 = sld [smem:[#allocation2 + $0x23]] }
  0xd2   : > { %v877_v43 = vpop.permute.xlu1 %876  ;;  %v875_v18 = vpop.permute.xlu0 %874  ;;  %v1358_v36 = vmul.f32 %v2565_v53, %v1356_v20  ;;  %v1357_v40 = vmul.f32 %v2568_v55, %v1356_v20  ;;  %v1618_v39 = vmul.f32 %v2834_v32, %v1616_v1  ;;  %v1174_v55 = vstv %s2825_s18  ;;  %s2067_s18 = sld [smem:[#allocation2 + $0xf]] }
  0xd3   : > { %v881_v2 = vadd.f32 %v877_v43, %v867_v34  ;;  %v880_v10 = vadd.f32 %v875_v18, %v866_v38  ;;  %v1617_v43 = vmul.f32 %v2837_v50, %v1616_v1  ;;  %v1176_v49 = vmul.f32 %v2817_v24, %v1174_v55 }
  0xd4   : > { %1587 = vrot.lane.b32.xlu1 %v1582_v41, %s2299_s26  ;;  %1585 = vrot.lane.b32.xlu0 %v1581_v42, %s2299_s26 }
  0xd6   : > { %v1333_v52 = vpop.permute.xlu1 %1332  ;;  %v1331_v57 = vpop.permute.xlu0 %1330 }
  0xd7   : > { %v1337_v34 = vadd.f32 %v1333_v52, %v1323_v37  ;;  %v1336_v38 = vadd.f32 %v1331_v57, %v1322_v16  ;;  %v1175_v52 = vmul.f32 %v2821_v62, %v1174_v55  ;;  %v1630_v57 = vstv %s2841_s19  ;;  %s2127_s19 = sld [smem:[#allocation2 + $0x36]] }
  0xd8   : > { %1145 = vrot.lane.b32.xlu1 %v1140_v45, %s2298_s30  ;;  %1143 = vrot.lane.b32.xlu0 %v1139_v47, %s2298_s30  ;;  %v1632_v26 = vmul.f32 %v2834_v32, %v1630_v57 }
  0xda   : > { %v891_v12 = vpop.permute.xlu1 %890  ;;  %v889_v19 = vpop.permute.xlu0 %888 }
  0xdb   : > { %v895_v21 = vadd.f32 %v891_v12, %v881_v2  ;;  %v894_v23 = vadd.f32 %v889_v19, %v880_v10  ;;  %v1196_v12 = vstv %s2850_s23  ;;  %v2871_v19 = vld [vmem:[%s2465_s0 + $0x4a] sm:$0xff]  ;;  %s2082_s23 = sld [smem:[#allocation2 + $0x18]] }
  0xdc   : > { %1601 = vrot.lane.b32.xlu1 %v1596_v59, %s2298_s30  ;;  %1599 = vrot.lane.b32.xlu0 %v1595_v60, %s2298_s30 }
  0xdd   : > { %v904_v48 = vadd.f32 %v902_v5, %v895_v21  ;;  %v903_v35 = vadd.f32 %v901_v9, %v894_v23  ;;  %v1631_v5 = vmul.f32 %v2837_v50, %v1630_v57  ;;  %v2867_v9 = vld [vmem:[%s2465_s0 + $0x52] sm:$0xff]  ;;  %v1392_v23 = vstv %s2852_s21  ;;  %s2891_s0 = sld [smem:[#allocation2 + $0x47]]  ;;  %s2930_s21 = sld [smem:[#allocation2 + $0x3c]] }
  0xde   : > { %v1347_v41 = vpop.permute.xlu1 %1346  ;;  %v1345_v42 = vpop.permute.xlu0 %1344 }
  0xdf   : > { %v1351_v37 = vadd.f32 %v1347_v41, %v1337_v34  ;;  %v1350_v16 = vadd.f32 %v1345_v42, %v1336_v38  ;;  %v936_v38 = vstv %s2843_s22  ;;  %v2884_v41 = vld [vmem:[%s2492_s27 + $0x52] sm:$0xff]  ;;  %v1652_v42 = vstv %s2859_s24  ;;  %s2132_s22 = sld [smem:[#allocation2 + $0x39]]  ;;  %s2939_s24 = sld [smem:[#allocation2 + $0x1b]] }
  0xe0   : > { %1167 = vrot.lane.b32.xlu1 %v1162_v28, %s2299_s26  ;;  %1165 = vrot.lane.b32.xlu0 %v1161_v33, %s2299_s26  ;;  %v938_v20 = vmul.f32 %v2583_v0, %v936_v38  ;;  %v937_v21 = vmul.f32 %v2586_v4, %v936_v38  ;;  %v1394_v0 = vmul.f32 %v2593_v7, %v1392_v23 }
  0xe1   : > { %v1360_v53 = vadd.f32 %v1358_v36, %v1351_v37  ;;  %v1359_v18 = vadd.f32 %v1357_v40, %v1350_v16  ;;  %v1197_v36 = vmul.f32 %v2871_v19, %v1196_v12  ;;  %v2888_v37 = vld [vmem:[%s2492_s27 + $0x4a] sm:$0xff]  ;;  %v1393_v16 = vmul.f32 %v2596_v11, %v1392_v23  ;;  %s2122_s27 = sld [smem:[#allocation2 + $0x33]] }
  0xe2   : > { %v914_v2 = vpop.permute.xlu1 %913  ;;  %v912_v10 = vpop.permute.xlu0 %911  ;;  %v1654_v7 = vmul.f32 %v2884_v41, %v1652_v42  ;;  %v1653_v55 = vmul.f32 %v2888_v37, %v1652_v42 }
  0xe3   : > { %v918_v45 = vadd.f32 %v914_v2, %v904_v48  ;;  %v917_v47 = vadd.f32 %v912_v10, %v903_v35  ;;  %v1198_v35 = vmul.f32 %v2867_v9, %v1196_v12 }
  0xe4   : > { %1623 = vrot.lane.b32.xlu1 %v1618_v39, %s2299_s26  ;;  %1621 = vrot.lane.b32.xlu0 %v1617_v43, %s2299_s26 }
  0xe6   : > { %v1370_v8 = vpop.permute.xlu1 %1369  ;;  %v1368_v34 = vpop.permute.xlu0 %1367 }
  0xe7   : > { %v1374_v59 = vadd.f32 %v1370_v8, %v1360_v53  ;;  %v1373_v60 = vadd.f32 %v1368_v34, %v1359_v18  ;;  %v1666_v34 = vstv %s2891_s0  ;;  %s2953_s0 = sld [smem:[#allocation2 + $0x1e]] }
  0xe8   : > { %1181 = vrot.lane.b32.xlu1 %v1176_v49, %s2298_s30  ;;  %1179 = vrot.lane.b32.xlu0 %v1175_v52, %s2298_s30  ;;  %v1668_v12 = vmul.f32 %v2884_v41, %v1666_v34 }
  0xea   : > { %v928_v28 = vpop.permute.xlu1 %927  ;;  %v926_v33 = vpop.permute.xlu0 %925 }
  0xeb   : > { %v932_v1 = vadd.f32 %v928_v28, %v918_v45  ;;  %v931_v48 = vadd.f32 %v926_v33, %v917_v47  ;;  %v1210_v45 = vstv %s2876_s20  ;;  %s2948_s20 = sld [smem:[#allocation2 + $0x3f]] }
  0xec   : > { %1637 = vrot.lane.b32.xlu1 %v1632_v26, %s2298_s30  ;;  %1635 = vrot.lane.b32.xlu0 %v1631_v5, %s2298_s30  ;;  %v1212_v57 = vmul.f32 %v2867_v9, %v1210_v45  ;;  %v1211_v8 = vmul.f32 %v2871_v19, %v1210_v45 }
  0xed   : > { %v940_v40 = vadd.f32 %v938_v20, %v932_v1  ;;  %v939_v4 = vadd.f32 %v937_v21, %v931_v48  ;;  %v1667_v20 = vmul.f32 %v2888_v37, %v1666_v34  ;;  %v1428_v1 = vstv %s2122_s27  ;;  %s2967_s27 = sld [smem:[#allocation2 + $0x21]] }
  0xee   : > { %v1384_v39 = vpop.permute.xlu1 %1383  ;;  %v1382_v43 = vpop.permute.xlu0 %1381 }
  0xef   : > { %v1388_v53 = vadd.f32 %v1384_v39, %v1374_v59  ;;  %v1387_v18 = vadd.f32 %v1382_v43, %v1373_v60  ;;  %v972_v60 = vstv %s2067_s18  ;;  %s2958_s18 = sld [smem:[#allocation2 + $0x42]] }
  0xf0   : > { %1203 = vrot.lane.b32.xlu1 %v1198_v35, %s2299_s26  ;;  %1201 = vrot.lane.b32.xlu0 %v1197_v36, %s2299_s26  ;;  %v974_v21 = vmul.f32 %v2611_v22, %v972_v60  ;;  %v973_v23 = vmul.f32 %v2614_v25, %v972_v60 }
  0xf1   : > { %v1396_v2 = vadd.f32 %v1394_v0, %v1388_v53  ;;  %v1395_v10 = vadd.f32 %v1393_v16, %v1387_v18 }
  0xf2   : > { %v950_v11 = vpop.permute.xlu1 %949  ;;  %v948_v47 = vpop.permute.xlu0 %947 }
  0xf3   : > { %v954_v49 = vadd.f32 %v950_v11, %v940_v40  ;;  %v953_v52 = vadd.f32 %v948_v47, %v939_v4  ;;  %v1430_v40 = vmul.f32 %v2621_v29, %v1428_v1  ;;  %v1429_v4 = vmul.f32 %v2624_v31, %v1428_v1 }
  0xf4   : > { %1659 = vrot.lane.b32.xlu1 %v1654_v7, %s2299_s26  ;;  %1657 = vrot.lane.b32.xlu0 %v1653_v55, %s2299_s26  ;;  %s2072_s26 = sld [smem:[#allocation2 + $0x12]] }
  0xf6   : > { %v1406_v38 = vpop.permute.xlu1 %1405  ;;  %v1404_v59 = vpop.permute.xlu0 %1403 }
  0xf7   : > { %v1410_v26 = vadd.f32 %v1406_v38, %v1396_v2  ;;  %v1409_v5 = vadd.f32 %v1404_v59, %v1395_v10 }
  0xf8   : > { %1217 = vrot.lane.b32.xlu1 %v1212_v57, %s2298_s30  ;;  %1215 = vrot.lane.b32.xlu0 %v1211_v8, %s2298_s30  ;;  %v1465_v57 = vstv %s2127_s19  ;;  %s2986_s19 = sld [smem:[#allocation2 + $0x48]] }
  0xf9   : > { %v1467_v60 = vmul.f32 %v2649_v51, %v1465_v57 }
  0xfa   : > { %v964_v28 = vpop.permute.xlu1 %963  ;;  %v962_v33 = vpop.permute.xlu0 %961  ;;  %v1009_v45 = vstv %s2072_s26  ;;  %s2976_s26 = sld [smem:[#allocation2 + $0x45]] }
  0xfb   : > { %v968_v48 = vadd.f32 %v964_v28, %v954_v49  ;;  %v967_v35 = vadd.f32 %v962_v33, %v953_v52  ;;  %v1011_v29 = vmul.f32 %v2639_v44, %v1009_v45  ;;  %v1010_v31 = vmul.f32 %v2642_v46, %v1009_v45 }
  0xfc   : > { %1673 = vrot.lane.b32.xlu1 %v1668_v12, %s2298_s30  ;;  %1671 = vrot.lane.b32.xlu0 %v1667_v20, %s2298_s30  ;;  %s2077_s30 = sld [smem:[#allocation2 + $0x15]] }
  0xfd   : > { %v976_v36 = vadd.f32 %v974_v21, %v968_v48  ;;  %v975_v0 = vadd.f32 %v973_v23, %v967_v35 }
  0xfe   : > { %v1420_v42 = vpop.permute.xlu1 %1419  ;;  %v1418_v16 = vpop.permute.xlu0 %1417 }
  0xff   : > { %v1424_v22 = vadd.f32 %v1420_v42, %v1410_v26  ;;  %v1423_v25 = vadd.f32 %v1418_v16, %v1409_v5  ;;  %v1466_v26 = vmul.f32 %v2652_v54, %v1465_v57 }
 0x101   : > { %v1432_v39 = vadd.f32 %v1430_v40, %v1424_v22  ;;  %v1431_v43 = vadd.f32 %v1429_v4, %v1423_v25 }
 0x102   : > { %v986_v53 = vpop.permute.xlu1 %985  ;;  %v984_v18 = vpop.permute.xlu0 %983  ;;  %v1045_v45 = vstv %s2077_s30  ;;  %s2989_s30 = sshll.u32 %s2459_s29, 3 }
 0x103   : > { %v990_v7 = vadd.f32 %v986_v53, %v976_v36  ;;  %v989_v55 = vadd.f32 %v984_v18, %v975_v0 }
 0x106   : > { %v1442_v2 = vpop.permute.xlu1 %1441  ;;  %v1440_v10 = vpop.permute.xlu0 %1439 }
 0x107   : > { %v1446_v11 = vadd.f32 %v1442_v2, %v1432_v39  ;;  %v1445_v47 = vadd.f32 %v1440_v10, %v1431_v43 }
 0x10a   : > { %v1000_v49 = vpop.permute.xlu1 %999  ;;  %v998_v52 = vpop.permute.xlu0 %997 }
 0x10b   : > { %v1004_v8 = vadd.f32 %v1000_v49, %v990_v7  ;;  %v1003_v34 = vadd.f32 %v998_v52, %v989_v55 }
 0x10d   : > { %v1013_v38 = vadd.f32 %v1011_v29, %v1004_v8  ;;  %v1012_v59 = vadd.f32 %v1010_v31, %v1003_v34  ;;  %v1047_v29 = vmul.f32 %v2671_v3, %v1045_v45  ;;  %v1046_v8 = vmul.f32 %v2674_v6, %v1045_v45 }
 0x10e   : > { %v1456_v5 = vpop.permute.xlu1 %1455  ;;  %v1454_v12 = vpop.permute.xlu0 %1453  ;;  %v1501_v34 = vstv %s2132_s22  ;;  %s2993_s22 = sld [smem:[#allocation2 + $0x49]] }
 0x10f   : > { %v1460_v20 = vadd.f32 %v1456_v5, %v1446_v11  ;;  %v1459_v21 = vadd.f32 %v1454_v12, %v1445_v47  ;;  %v1503_v5 = vmul.f32 %v2682_v14, %v1501_v34 }
 0x111   : > { %v1469_v23 = vadd.f32 %v1467_v60, %v1460_v20  ;;  %v1468_v28 = vadd.f32 %v1466_v26, %v1459_v21 }
 0x112   : > { %v1023_v44 = vpop.permute.xlu1 %1022  ;;  %v1021_v33 = vpop.permute.xlu0 %1020 }
 0x113   : > { %v1027_v11 = vadd.f32 %v1023_v44, %v1013_v38  ;;  %v1026_v47 = vadd.f32 %v1021_v33, %v1012_v59  ;;  %v1502_v38 = vmul.f32 %v2685_v17, %v1501_v34  ;;  %v1081_v59 = vstv %s2082_s23 }
 0x114   : > { %v1082_v14 = vmul.f32 %v2720_v58, %v1081_v59 }
 0x116   : > { %v1479_v46 = vpop.permute.xlu1 %1478  ;;  %v1477_v1 = vpop.permute.xlu0 %1476 }
 0x117   : > { %v1483_v60 = vadd.f32 %v1479_v46, %v1469_v23  ;;  %v1482_v26 = vadd.f32 %v1477_v1, %v1468_v28  ;;  %v1083_v28 = vmul.f32 %v2716_v56, %v1081_v59  ;;  %v1537_v46 = vstv %s2930_s21  ;;  %s775_s21 = scalar_lea.vmem %s3122_s12, %s2459_s29 }
 0x11a   : > { %v1037_v48 = vpop.permute.xlu1 %1036  ;;  %v1035_v35 = vpop.permute.xlu0 %1034 }
 0x11b   : > { %v1041_v52 = vadd.f32 %v1037_v48, %v1027_v11  ;;  %v1040_v57 = vadd.f32 %v1035_v35, %v1026_v47  ;;  %v1118_v47 = vstv %s2939_s24  ;;  %s745_s24 = scalar_lea.vmem %s3113_s3, %s2989_s30 }
 0x11d   : > { %v1049_v44 = vadd.f32 %v1047_v29, %v1041_v52  ;;  %v1048_v33 = vadd.f32 %v1046_v8, %v1040_v57 }
 0x11e   : > { %v1493_v36 = vpop.permute.xlu1 %1492  ;;  %v1491_v0 = vpop.permute.xlu0 %1490 }
 0x11f   : > { %v1497_v20 = vadd.f32 %v1493_v36, %v1483_v60  ;;  %v1496_v21 = vadd.f32 %v1491_v0, %v1482_v26 }
 0x121   : > { %v1505_v48 = vadd.f32 %v1503_v5, %v1497_v20  ;;  %v1504_v35 = vadd.f32 %v1502_v38, %v1496_v21 }
 0x122   : > { %v1059_v40 = vpop.permute.xlu1 %1058  ;;  %v1057_v4 = vpop.permute.xlu0 %1056 }
 0x123   : > { %v1063_v6 = vadd.f32 %v1059_v40, %v1049_v44  ;;  %v1062_v23 = vadd.f32 %v1057_v4, %v1048_v33  ;;  %v1539_v40 = vmul.f32 %v2733_v13, %v1537_v46  ;;  %v1538_v4 = vmul.f32 %v2736_v15, %v1537_v46 }
 0x126   : > { %v1515_v42 = vpop.permute.xlu1 %1514  ;;  %v1513_v51 = vpop.permute.xlu0 %1512 }
 0x127   : > { %v1519_v36 = vadd.f32 %v1515_v42, %v1505_v48  ;;  %v1518_v0 = vadd.f32 %v1513_v51, %v1504_v35  ;;  %v1120_v42 = vmul.f32 %v2769_v61, %v1118_v47  ;;  %v1119_v51 = vmul.f32 %v2773_v63, %v1118_v47 }
 0x128   : > { %v1190_v48 = vstv %s2967_s27  ;;  %s757_s27 = scalar_lea.vmem %s3116_s6, %s2989_s30 }
 0x12a   : > { %v1073_v16 = vpop.permute.xlu1 %1072  ;;  %v1071_v54 = vpop.permute.xlu0 %1070 }
 0x12b   : > { %v1077_v45 = vadd.f32 %v1073_v16, %v1063_v6  ;;  %v1076_v11 = vadd.f32 %v1071_v54, %v1062_v23  ;;  %v1574_v54 = vstv %s2948_s20  ;;  %s753_s20 = scalar_lea.vmem %s3115_s5, %s2989_s30 }
 0x12c   : > { %v1576_v61 = vmul.f32 %v2783_v27, %v1574_v54  ;;  %v1575_v63 = vmul.f32 %v2787_v30, %v1574_v54  ;;  %v1610_v30 = vstv %s2958_s18  ;;  %s749_s18 = scalar_lea.vmem %s3114_s4, %s2989_s30  ;;  %s731_s30 = scalar_lea.vmem [#allocation5], %s730_s1 }
 0x12d   : > { %v1085_v57 = vadd.f32 %v1083_v28, %v1077_v45  ;;  %v1084_v8 = vadd.f32 %v1082_v14, %v1076_v11 }
 0x12e   : > { %v1529_v22 = vpop.permute.xlu1 %1528  ;;  %v1527_v25 = vpop.permute.xlu0 %1526 }
 0x12f   : > { %v1533_v58 = vadd.f32 %v1529_v22, %v1519_v36  ;;  %v1532_v52 = vadd.f32 %v1527_v25, %v1518_v0 }
 0x131   : > { %v1541_v15 = vadd.f32 %v1539_v40, %v1533_v58  ;;  %v1540_v26 = vadd.f32 %v1538_v4, %v1532_v52  ;;  %v1646_v4 = vstv %s2976_s26 }
 0x132   : > { %v1095_v39 = vpop.permute.xlu1 %1094  ;;  %v1093_v43 = vpop.permute.xlu0 %1092  ;;  %v1647_v52 = vmul.f32 %v2888_v37, %v1646_v4 }
 0x133   : > { %v1099_v34 = vadd.f32 %v1095_v39, %v1085_v57  ;;  %v1098_v16 = vadd.f32 %v1093_v43, %v1084_v8  ;;  %v1154_v43 = vstv %s2953_s0  ;;  %s772_s0 = scalar_lea.vmem %s3121_s11, %s2459_s29 }
 0x134   : > { %v1155_v27 = vmul.f32 %v2821_v62, %v1154_v43 }
 0x136   : > { %v2917_v53 = vpop.permute.xlu1 %1550  ;;  %v2919_v18 = vpop.permute.xlu0 %1548 }
 0x137   : > { %v1555_v25 = vadd.f32 %v2917_v53, %v1541_v15  ;;  %v1554_v39 = vadd.f32 %v2919_v18, %v1540_v26  ;;  %v1156_v18 = vmul.f32 %v2817_v24, %v1154_v43  ;;  %v1611_v24 = vmul.f32 %v2837_v50, %v1610_v30 }
 0x13a   : > { %v2921_v7 = vpop.permute.xlu1 %1108  ;;  %v2923_v55 = vpop.permute.xlu0 %1106 }
 0x13b   : > { %v1113_v5 = vadd.f32 %v2921_v7, %v1099_v34  ;;  %v1112_v22 = vadd.f32 %v2923_v55, %v1098_v16 }
 0x13d   : > { %v1122_v21 = vadd.f32 %v1120_v42, %v1113_v5  ;;  %v1121_v55 = vadd.f32 %v1119_v51, %v1112_v22  ;;  %v1224_v51 = vstv %s2986_s19  ;;  %s778_s19 = scalar_lea.vmem %s3123_s13, %s2459_s29 }
 0x13e   : > { %v2925_v2 = vpop.permute.xlu1 %1564  ;;  %v2927_v10 = vpop.permute.xlu0 %1562 }
 0x13f   : > { %v1569_v20 = vadd.f32 %v2925_v2, %v1555_v25  ;;  %v1568_v7 = vadd.f32 %v2927_v10, %v1554_v39  ;;  %v1700_v25 = vld [vmem:[%s749_s18] sm:$0xff] }
 0x140   : > { %v1725_v39 = vld [vmem:[%s760_s2] sm:$0x1] }
 0x141   : > { %v1578_v23 = vadd.f32 %v1576_v61, %v1569_v20  ;;  %v1577_v2 = vadd.f32 %v1575_v63, %v1568_v7  ;;  %v1726_v61 = vld [vmem:[%s763_s28] sm:$0x1]  ;;  %v1680_v20 = vstv %s2993_s22  ;;  %s3158_s28 = sld [smem:[#allocation19_spill]] }
 0x142   : > { %v2932_v31 = vpop.permute.xlu1 %1131  ;;  %v2934_v49 = vpop.permute.xlu0 %1129 }
 0x143   : > { %v1136_v53 = vadd.f32 %v2932_v31, %v1122_v21  ;;  %v1135_v44 = vadd.f32 %v2934_v49, %v1121_v55  ;;  %v1612_v49 = vmul.f32 %v2834_v32, %v1610_v30 }
 0x146   : > { %v2941_v3 = vpop.permute.xlu1 %1587  ;;  %v2943_v12 = vpop.permute.xlu0 %1585 }
 0x147   : > { %v1592_v14 = vadd.f32 %v2941_v3, %v1578_v23  ;;  %v1591_v31 = vadd.f32 %v2943_v12, %v1577_v2  ;;  %v1191_v12 = vmul.f32 %v2871_v19, %v1190_v48 }
 0x14a   : > { %v1146_v17 = vpop.permute.xlu1 %1145  ;;  %v1144_v1 = vpop.permute.xlu0 %1143 }
 0x14b   : > { %v1150_v28 = vadd.f32 %v1146_v17, %v1136_v53  ;;  %v1149_v10 = vadd.f32 %v1144_v1, %v1135_v44  ;;  %v1192_v1 = vmul.f32 %v2867_v9, %v1190_v48  ;;  %v1648_v9 = vmul.f32 %v2884_v41, %v1646_v4  ;;  %v1735_v48 = vld [vmem:[%s766_s17] sm:$0x1]  ;;  %s787_s17 = scalar_lea.vmem %s3126_s16, %s2459_s29 }
 0x14c   : > { %v1727_v53 = vsub.f32 %v1725_v39, %v1726_v61 }
 0x14d   : > { %v1158_v11 = vadd.f32 %v1156_v18, %v1150_v28  ;;  %v1157_v36 = vadd.f32 %v1155_v27, %v1149_v10 }
 0x14e   : > { %v1602_v56 = vpop.permute.xlu1 %1601  ;;  %v1600_v29 = vpop.permute.xlu0 %1599 }
 0x14f   : > { %v1606_v35 = vadd.f32 %v1602_v56, %v1592_v14  ;;  %v1605_v45 = vadd.f32 %v1600_v29, %v1591_v31 }
 0x151   : > { %v1614_v32 = vadd.f32 %v1612_v49, %v1606_v35  ;;  %v1613_v50 = vadd.f32 %v1611_v24, %v1605_v45  ;;  %v1712_v49 = vld [vmem:[%s753_s20] sm:$0xff]  ;;  %s1808_s20 = scalar_lea.sflag [#allocation3], %s730_s1 }
 0x152   : > { %v1168_v13 = vpop.permute.xlu1 %1167  ;;  %v1166_v60 = vpop.permute.xlu0 %1165  ;;  %v1713_v24 = vld [vmem:[%s757_s27] sm:$0xff]  ;;  %s784_s27 = scalar_lea.vmem %s3125_s15, %s2459_s29 }
 0x153   : > { %v1172_v0 = vadd.f32 %v1168_v13, %v1158_v11  ;;  %v1171_v17 = vadd.f32 %v1166_v60, %v1157_v36  ;;  %v1699_v60 = vld [vmem:[%s745_s24] sm:$0xff]  ;;  %s781_s24 = scalar_lea.vmem %s3124_s14, %s2459_s29  ;;  %v1714_v36 = vsub.f32 %v1712_v49, %v1713_v24 }
 0x154   : > { %v1701_v55 = vsub.f32 %v1699_v60, %v1700_v25  ;;  %v1762_v35 = vld [vmem:[%s775_s21] sm:$0x1] }
 0x156   : > { %v1624_v38 = vpop.permute.xlu1 %1623  ;;  %v1622_v59 = vpop.permute.xlu0 %1621  ;;  %v1702_v14 = vand.u32 2147483647, %v1701_v55  ;;  %v1779_v55 = vlaneseq }
 0x157   : > { %v1628_v29 = vadd.f32 %v1624_v38, %v1614_v32  ;;  %v1627_v58 = vadd.f32 %v1622_v59, %v1613_v50  ;;  %v1715_v32 = vand.u32 2147483647, %v1714_v36 }
 0x15a   : > { %v1182_v33 = vpop.permute.xlu1 %1181  ;;  %v1180_v6 = vpop.permute.xlu0 %1179 }
 0x15b   : > { %v1186_v47 = vadd.f32 %v1182_v33, %v1172_v0  ;;  %v1185_v56 = vadd.f32 %v1180_v6, %v1171_v17  ;;  %v1742_v33 = vld [vmem:[%s778_s19] sm:$0x1]  ;;  %s1820_s19 = sshll.u32 %s731_s30, 4  ;;  %s3070_s19 = int_to_ptr.vmem [resolvable:$true] %s1820_s19 }
 0x15c   : > { %v1743_v6 = vld [vmem:[%s781_s24] sm:$0x1]  ;;  %s769_s24 = scalar_lea.vmem %s3120_s10, %s2459_s29  ;;  %s3156_s29 = sld [smem:[#allocation11_spill]] }
 0x15d   : > { %v1194_v16 = vadd.f32 %v1192_v1, %v1186_v47  ;;  %v1193_v42 = vadd.f32 %v1191_v12, %v1185_v56  ;;  %v1753_v0 = vld [vmem:[%s769_s24] sm:$0x1]  ;;  %s2229_s18 = scalar_lea.vmem %s3070_s19, 16 }
 0x15e   : > { %v1638_v46 = vpop.permute.xlu1 %1637  ;;  %v1636_v62 = vpop.permute.xlu0 %1635  ;;  %v1763_v12 = vsub.f32 %v1753_v0, %v1762_v35  ;;  %p2230_p9 = scmp.ne.s32.totalorder %s3070_s19, %s2229_s18 }
 0x15f   : > { %v1642_v8 = vadd.f32 %v1638_v46, %v1628_v29  ;;  %v1641_v34 = vadd.f32 %v1636_v62, %v1627_v58  ;;  %v1728_v46 = vand.u32 2147483647, %v1727_v53  ;;  %v1744_v62 = vsub.f32 %v1742_v33, %v1743_v6  ;;  %v1769_v58 = vld [vmem:[%s784_s27] sm:$0x1]  ;;  %s2300_s27 = smov [#allocation5]  }
 0x160   : > { %v1764_v29 = vand.u32 2147483647, %v1763_v12  ;;  %p2231_p10 = pnand %p2230_p9, %p2429_p5  ;;  %s2233_s22 = sshll.u32 %s2300_s27, 4  ;;  %s2234_s22 = int_to_ptr.vmem [resolvable:$false] %s2233_s22 }
 0x161   : > { %v1650_v15 = vadd.f32 %v1648_v9, %v1642_v8  ;;  %v1649_v26 = vadd.f32 %v1647_v52, %v1641_v34  ;;  %v1730_v17 = vsel %vm1729_vm1, %v1728_v46, 0.0  ;;  %v1745_v1 = vand.u32 2147483647, %v1744_v62  ;;  %v1770_v9 = vld [vmem:[%s787_s17] sm:$0x1]  ;;  %s2235_s26 = scalar_lea.vmem %s2234_s22, 32  ;;  %p2236_p13 = scmp.lt.s32.totalorder %s3070_s19, %s2234_s22 }
 0x162   : > { %v1204_v3 = vpop.permute.xlu1 %1203  ;;  %v1202_v40 = vpop.permute.xlu0 %1201  ;;  %v1771_v8 = vsub.f32 %v1769_v58, %v1770_v9  ;;  %s2158_s21 = sshll.u32 %s3156_s29, 4  ;;  %p2232_p12 = pneg %p2231_p10 }
 0x163   : > { %v1208_v41 = vadd.f32 %v1204_v3, %v1194_v16  ;;  %v1207_v37 = vadd.f32 %v1202_v40, %v1193_v42  ;;  %v1736_v3 = vsub.f32 %v1725_v39, %v1735_v48  ;;  %v1754_v40 = vld [vmem:[%s772_s0] sm:$0x1]  ;;  %v1747_v50 = vsel %vm1746_vm2, %v1745_v1, 0.0  ;;  %s3068_s0 = scalar_lea.hbm %s3158_s28, %s2158_s21  ;;  %p2237_p0 = scmp.lt.s32.totalorder %s2235_s26, %s2229_s18 }
 0x164   : > { %v1755_v56 = vsub.f32 %v1753_v0, %v1754_v40  ;;  %v1772_v16 = vand.u32 2147483647, %v1771_v8 }
 0x165   : > { %v1737_v47 = vand.u32 2147483647, %v1736_v3  ;;  %p2238_p1 = por %p2237_p0, %p2236_p13 }
 0x166   : > { %v1660_v19 = vpop.permute.xlu1 %1659  ;;  %v1658_v57 = vpop.permute.xlu0 %1657  ;;  %v1756_v52 = vand.u32 2147483647, %v1755_v56  ;;  %v1773_v42 = vsel %vm1746_vm2, %v1772_v16, 0.0 }
 0x167   : > { %v1664_v63 = vadd.f32 %v1660_v19, %v1650_v15  ;;  %v1663_v43 = vadd.f32 %v1658_v57, %v1649_v26  ;;  %v1738_v19 = vsel %vm1729_vm1, %v1737_v47, 0.0  ;;  %v1765_v57 = vsel %vm1729_vm1, %v1764_v29, 0.0  ;;  %p2239_p2 = pnand %p2238_p1, %p2232_p12 }
 0x168   : > { %v1757_v34 = vsel %vm1729_vm1, %v1756_v52, 0.0 }
 0x16a   : > { %v1218_v54 = vpop.permute.xlu1 %1217  ;;  %v1216_v13 = vpop.permute.xlu0 %1215 }
 0x16b   : > { %v1222_v5 = vadd.f32 %v1218_v54, %v1208_v41  ;;  %v1221_v22 = vadd.f32 %v1216_v13, %v1207_v37 }
 0x16d   : > { %v1226_v38 = vadd.f32 %v1224_v51, %v1222_v5  ;;  %v1225_v59 = vadd.f32 %v1224_v51, %v1221_v22 }
 0x16e   : > { %v1674_v7 = vpop.permute.xlu1 %1673  ;;  %v1672_v21 = vpop.permute.xlu0 %1671 }
 0x16f   : > { %v1678_v44 = vadd.f32 %v1674_v7, %v1664_v63  ;;  %v1677_v18 = vadd.f32 %v1672_v21, %v1663_v43  ;;  %v1228_v27 = vmul.f32 %v1226_v38, %v1226_v38  ;;  %v1227_v30 = vmul.f32 %v1225_v59, %v1225_v59 }
 0x171   : > { %v1682_v23 = vadd.f32 %v1680_v20, %v1678_v44  ;;  %v1681_v2 = vadd.f32 %v1680_v20, %v1677_v18  ;;  %v1233_v28 = vsel %vm1229_vm0, %v1228_v27, 0.0  ;;  %v1230_v10 = vsel %vm1229_vm0, %v1227_v30, 0.0 }
 0x172   : > { %1234 = vadd.xlane.f32.xlu1 %v1233_v28  ;;  %1231 = vadd.xlane.f32.xlu0 %v1230_v10 }
 0x173   : > { %v1683_v31 = vmul.f32 %v1681_v2, %v1681_v2  ;;  %v1684_v45 = vmul.f32 %v1682_v23, %v1682_v23  ;;  %v1780_v2 = vand.u32 127, %v1779_v55 }
 0x175   : > { %v1685_v11 = vsel %vm1229_vm0, %v1683_v31, 0.0  ;;  %v1688_v4 = vsel %vm1229_vm0, %v1684_v45, 0.0  ;;  %vm1781_vm3 = vcmp.eq.s32.totalorder %v1780_v2, 0  ;;  %vm1784_vm4 = vcmp.eq.s32.totalorder %v1780_v2, 1 }
 0x176   : > { %1686 = vadd.xlane.f32.xlu0 %v1685_v11  ;;  %1703 = vadd.xlane.f32.xlu1 %v1702_v14  ;;  %vm1787_vm5 = vcmp.eq.s32.totalorder %v1780_v2, 2  ;;  %vm1790_vm6 = vcmp.eq.s32.totalorder %v1780_v2, 3  ;;  %vm1793_vm7 = vcmp.eq.s32.totalorder %v1780_v2, 4  ;;  %vm1796_vm8 = vcmp.eq.s32.totalorder %v1780_v2, 5 }
 0x177   : > { %vm1799_vm9 = vcmp.eq.s32.totalorder %v1780_v2, 6  ;;  %vm1802_vm10 = vcmp.eq.s32.totalorder %v1780_v2, 7 }
 0x17a   : > { %1689 = vadd.xlane.f32.xlu0 %v1688_v4  ;;  %1731 = vadd.xlane.f32.xlu1 %v1730_v17 }
 0x17e   : > { %1716 = vadd.xlane.f32.xlu0 %v1715_v32  ;;  %1748 = vadd.xlane.f32.xlu1 %v1747_v50 }
 0x182   : > { %1739 = vadd.xlane.f32.xlu0 %v1738_v19  ;;  %1766 = vadd.xlane.f32.xlu1 %v1765_v57 }
 0x186   : > { %1758 = vadd.xlane.f32.xlu0 %v1757_v34 }
 0x18a   : > { %1774 = vadd.xlane.f32.xlu0 %v1773_v42 }
 0x1ff   : > { %v1235_v41 = vpop.xlane.xlu1 %1234  ;;  %v1232_v37 = vpop.xlane.xlu0 %1231 }
 0x200   : > { %v1236_v51 = vadd.f32 %v1235_v41, %v1232_v37 }
 0x202   : > { %v1237_v54 = vrot.slane %v1236_v51, 4 }
 0x203   : > { %v1687_v13 = vpop.xlane.xlu0 %1686  ;;  %v1704_v60 = vpop.xlane.xlu1 %1703 }
 0x204   : > { %v1238_v15 = vadd.f32 %v1237_v54, %v1236_v51  ;;  %v1705_v26 = vrot.slane %v1704_v60, 4 }
 0x206   : > { %v1239_v5 = vrot.slane %v1238_v15, 2  ;;  %v1706_v22 = vadd.f32 %v1705_v26, %v1704_v60 }
 0x207   : > { %v1690_v25 = vpop.xlane.xlu0 %1689  ;;  %v1732_v53 = vpop.xlane.xlu1 %1731 }
 0x208   : > { %v1240_v39 = vadd.f32 %v1239_v5, %v1238_v15  ;;  %v1707_v61 = vrot.slane %v1706_v22, 2  ;;  %v1691_v63 = vadd.f32 %v1690_v25, %v1687_v13  ;;  %v1734_v4 = vmul.f32 0.0078125, %v1732_v53 }
 0x20a   : > { %v1708_v43 = vadd.f32 %v1707_v61, %v1706_v22  ;;  %v1692_v38 = vrot.slane %v1691_v63, 4  ;;  %v1241_v20 = vrot.slane %v1240_v39, 1  ;;  %v1794_v58 = vsel %vm1793_vm7, %v1734_v4, 0.0 }
 0x20b   : > { %v1717_v59 = vpop.xlane.xlu0 %1716  ;;  %v1749_v31 = vpop.xlane.xlu1 %1748 }
 0x20c   : > { %v1693_v7 = vadd.f32 %v1692_v38, %v1691_v63  ;;  %v1718_v21 = vrot.slane %v1717_v59, 4  ;;  %v1709_v44 = vrot.slane %v1708_v43, 1  ;;  %v1242_v33 = vadd.f32 %v1241_v20, %v1240_v39 }
 0x20e   : > { %v1694_v18 = vrot.slane %v1693_v7, 2  ;;  %v1719_v27 = vadd.f32 %v1718_v21, %v1717_v59  ;;  %v1710_v28 = vadd.f32 %v1709_v44, %v1708_v43  ;;  %v1243_v24 = vmul.f32 0.00390625, %v1242_v33 }
 0x20f   : > { %v1740_v30 = vpop.xlane.xlu0 %1739  ;;  %v1767_v11 = vpop.xlane.xlu1 %1766 }
 0x210   : > { %v1695_v6 = vadd.f32 %v1694_v18, %v1693_v7  ;;  %v1720_v23 = vrot.slane %v1719_v27, 2  ;;  %v1711_v48 = vmul.f32 0.0009765625, %v1710_v28  ;;  %v1782_v0 = vsel %vm1781_vm3, %v1243_v24, 0.0 }
 0x211   : > { %v1751_v3 = vadd.f32 %v1749_v31, %v1740_v30 }
 0x212   : > { %v1696_v10 = vrot.slane %v1695_v6, 1  ;;  %v1721_v14 = vadd.f32 %v1720_v23, %v1719_v27  ;;  %v1788_v40 = vsel %vm1787_vm5, %v1711_v48, 0.0 }
 0x213   : > { %v1759_v49 = vpop.xlane.xlu0 %1758  ;;  %v1752_v56 = vmul.f32 0.0052083335, %v1751_v3 }
 0x214   : > { %v1697_v46 = vadd.f32 %v1696_v10, %v1695_v6  ;;  %v1722_v62 = vrot.slane %v1721_v14, 1  ;;  %v1761_v9 = vmul.f32 0.0078125, %v1759_v49 }
 0x215   : > { %v1797_v57 = vsel %vm1796_vm8, %v1752_v56, 0.0 }
 0x216   : > { %v1698_v35 = vmul.f32 0.00390625, %v1697_v46  ;;  %v1723_v45 = vadd.f32 %v1722_v62, %v1721_v14  ;;  %v1800_v34 = vsel %vm1799_vm9, %v1761_v9, 0.0 }
 0x217   : > { %v1775_v36 = vpop.xlane.xlu0 %1774 }
 0x218   : > { %v1785_v17 = vsel %vm1784_vm4, %v1698_v35, 0.0  ;;  %v1724_v1 = vmul.f32 0.0009765625, %v1723_v45  ;;  %v1777_v32 = vadd.f32 %v1775_v36, %v1767_v11 }
 0x219   : > { %v1786_v12 = vadd.f32 %v1785_v17, %v1782_v0 }
 0x21a   : > { %v1791_v47 = vsel %vm1790_vm6, %v1724_v1, 0.0  ;;  %v1778_v19 = vmul.f32 0.0052083335, %v1777_v32 }
 0x21b   : > { %v1789_v50 = vadd.f32 %v1788_v40, %v1786_v12 }
 0x21c   : > { %v1803_v16 = vsel %vm1802_vm10, %v1778_v19, 0.0 }
 0x21d   : > { %v1792_v29 = vadd.f32 %v1791_v47, %v1789_v50 }
 0x21f   : > { %v1795_v52 = vadd.f32 %v1794_v58, %v1792_v29 }
 0x221   : > { %v1798_v8 = vadd.f32 %v1797_v57, %v1795_v52 }
 0x223   : > { %v1801_v42 = vadd.f32 %v1800_v34, %v1798_v8 }
 0x225   : > { %v1804_v41 = vadd.f32 %v1803_v16, %v1801_v42 }
 0x227   : > { %1806 = vst.msk [vmem:[%s731_s30] sm:$0x1] %vm1805_vm11, %v1804_v41 }
 0x228   : > { %2242 = shalt.err (!%p2239_p2)
}
 0x229   : > { %s2243_s17 = scalar_lea.hbm %s3068_s0, 16  ;;  %s2247_s21 = scalar_lea.hbm %s3158_s28, 32 }
 0x22a   : > { %p2244_p3 = scmp.ne.s32.totalorder %s3068_s0, %s2243_s17  ;;  %p2248_p8 = scmp.lt.u32.totalorder %s3068_s0, %s3158_s28 }
 0x22b   : > { %p2249_p11 = scmp.lt.u32.totalorder %s2247_s21, %s2243_s17  ;;  %p2251_p10 = scmp.lt.u32.totalorder %s2243_s17, %s3068_s0 }
 0x22c   : > { %p2245_p4 = pnand %p2244_p3, %p2429_p5 }
 0x22d   : > { %p2250_p9 = por %p2249_p11, %p2248_p8 }
 0x22e   : > { %p2246_p7 = pneg %p2245_p4 }
 0x22f   : > { %p2252_p12 = por %p2251_p10, %p2250_p9 }
 0x231   : > { %p2253_p13 = pnand %p2252_p12, %p2246_p7 }
 0x233   : > { %2256 = shalt.err (!%p2253_p13)
}
 0x234   : > { %2166 = dma.vmem_to_hbm [thread:$0]  (%p2429_p5), %s3070_s19, 16, %s3068_s0, %s1808_s20  }
 0x235 PF: > { %s3159_s2 = sld [smem:[#allocation10_spill]]  ;;  %s3160_s18 = sld [smem:[#allocation8_spill]] }
 0x23b   : > { %p2178_p0 = scmp.ge.s32.totalorder %s3159_s2, 2  ;;  %s1832_s22 = sand.u32 1, %s3160_s18  }
 0x23c   : > { %s1833_s26 = scalar_lea.sflag [#allocation3], %s1832_s22 }
 0x23d   : > { %p2173_p1 = pnand %p2178_p0, %p2433_p6 }
 0x23f   : > { %2278 = dma.done.wait (!%p2173_p1), %s1833_s26, 16  }
 0x240   : > { %2280 = vsyncadd (!%p2173_p1), %s1833_s26, 4294967280  ;;  %s3162_s27 = sld [smem:[#allocation12_spill]]  ;;  %s3163_s17 = sld [smem:[#allocation9_spill]] }
 0x241   : > { %s3164_s26 = sld [smem:[#allocation13_spill]]  ;;  %s3165_s24 = smov %s2287_s25 }
 0x246   : > { %p28_p2 = scmp.ge.s32.totalorder %s3162_s27, 4   ;;  %s3166_s25 = smov %s3163_s17 }
 0x248   :  { %30 = sbr.rel (!%p28_p2) target bundleno = 9 (0x9), region = 179 }
 0x24f   :  { %1837 = vsyncpa [#allocation3], 1 }
 0x250   :  { %1839 = vsyncpa [#allocation3 + $0x1], 1 }
 0x251   :  { %1840 = vsyncpa [#allocation4], 1 }
 0x252   :  { %1842 = vsyncpa [#allocation4 + $0x1], 1 }

</bundles_post_ra>
